<compile_context>
chip_gen: v5e
topology: v5e:2x2
jax: 0.10.0
libtpu: 0.0.40
codegen_flags: <defaults>
</compile_context>

<pallas_src>
import functools
import math

import jax
import jax.numpy as jnp
from jax.experimental import pallas as pl
from jax.experimental.pallas import tpu as pltpu


def mha_kernel(x_ref, xt_ref, bias_ref,
               wqt_ref, bq_ref, wk_ref, bkt_ref, wvt_ref, bv_ref, wot_ref, bo_ref,
               ans_ref, attn_ref, kbig_ref, vbig_ref,
               *, num_heads, head_k, head_v, scale, compute_dtype):
    H, dh, dv = num_heads, head_k, head_v
    L = bias_ref.shape[0]
    cd = compute_dtype

    x = x_ref[...]        # (L, Din)
    xt = xt_ref[...]      # (Din, L)
    bias = bias_ref[...]  # (L, L)

    # Full-width projections with natural (row-major) contractions: no in-kernel
    # transposes, no transposed-RHS dot_general.  q is pre-scaled by 1/sqrt(dh).
    q = (jnp.dot(x.astype(cd), wqt_ref[...].astype(cd),
                 preferred_element_type=jnp.float32) + bq_ref[...]) * scale    # (L, H*dh)
    kT = jnp.dot(wk_ref[...].astype(cd), xt.astype(cd),
                 preferred_element_type=jnp.float32) + bkt_ref[...]            # (H*dh, L)
    v = jnp.dot(x.astype(cd), wvt_ref[...].astype(cd),
                preferred_element_type=jnp.float32) + bv_ref[...]              # (L, H*dv)

    # Assemble block-diagonal K^T (H*dh, H*L) and V (H*L, H*dv) in VMEM scratch via
    # static-offset sub-tile stores (replaces 2*H tiny per-head matmuls with two
    # full-width MXU matmuls below).  Re-zeroed every step so it is safe when the
    # parallel batch axis is split across TensorCores.
    kbig_ref[...] = jnp.zeros_like(kbig_ref)
    vbig_ref[...] = jnp.zeros_like(vbig_ref)
    for h in range(H):                                            # unrolled; H static
        kbig_ref[h * dh:(h + 1) * dh, h * L:(h + 1) * L] = kT[h * dh:(h + 1) * dh, :]
        vbig_ref[h * L:(h + 1) * L, h * dv:(h + 1) * dv] = v[:, h * dv:(h + 1) * dv]

    # One MXU matmul for ALL heads' logits: (L, H*dh) @ (H*dh, H*L) -> (L, H*L).
    logits = jnp.dot(q.astype(cd), kbig_ref[...].astype(cd),
                     preferred_element_type=jnp.float32)

    # Per-head numerically stable softmax over static 16-lane segments; each head's
    # probabilities are written directly into the lane-dense output tile (VMEM), no
    # register concatenation.
    for h in range(H):                                            # unrolled; H static
        seg = logits[:, h * L:(h + 1) * L] + bias                 # (L, L)
        m = jnp.max(seg, axis=-1, keepdims=True)
        p = jnp.exp(seg - m)
        s = jnp.sum(p, axis=-1, keepdims=True)
        r = pl.reciprocal(s, approx=True)                         # EUP slot (cheap)
        r = r * (2.0 - s * r)                                     # Newton step -> f32-accurate
        attn_ref[:, h * L:(h + 1) * L] = p * r
    # TODO(synk): attention dropout would be applied here in training mode.

    # One MXU matmul for ALL heads' context: (L, H*L) @ (H*L, H*dv) -> (L, H*dv),
    # already in combine_heads layout.
    attn_all = attn_ref[...]
    ctx = jnp.dot(attn_all.astype(cd), vbig_ref[...].astype(cd),
                  preferred_element_type=jnp.float32)

    # Single full-width output projection.
    ans_ref[...] = jnp.dot(ctx.astype(cd), wot_ref[...].astype(cd),
                           preferred_element_type=jnp.float32) + bo_ref[...]


def multihead_attention(x, bias, params, num_heads, compute_dtype=jnp.float32):
    B, L, Din = x.shape
    wq, bq = params["wq"], params["bq"]
    wk, bk = params["wk"], params["bk"]
    wv, bv = params["wv"], params["bv"]
    wo, bo = params["wo"], params["bo"]

    key_size = wq.shape[0]
    value_size = wv.shape[0]
    out_size = wo.shape[0]
    H = num_heads
    dh = key_size // H
    dv = value_size // H
    scale = 1.0 / math.sqrt(dh)

    # Wrapper-side layout plumbing (tiny, one-time XLA ops): pre-transposed weights
    # and activations so the kernel needs no transposes at all.
    xt = jnp.swapaxes(x, 1, 2)              # (B, Din, L)
    wqT = wq.T                              # (Din, key)
    wvT = wv.T                              # (Din, value)
    woT = wo.T                              # (value, out)
    bq2 = bq.reshape(1, key_size)
    bkT = bk.reshape(key_size, 1)
    bv2 = bv.reshape(1, value_size)
    bo2 = bo.reshape(1, out_size)

    kernel = functools.partial(mha_kernel, num_heads=H, head_k=dh, head_v=dv,
                               scale=scale, compute_dtype=compute_dtype)

    # Advisory cost estimate for the XLA scheduler.
    flops = B * (2 * L * Din * (2 * key_size + value_size)       # Q/K/V projections
                 + 2 * L * key_size * (H * L)                    # stacked logits
                 + 2 * L * (H * L) * value_size                  # stacked context
                 + 2 * L * value_size * out_size                 # output projection
                 + 6 * H * L * L)                                # softmax elementwise
    transcendentals = B * H * L * (L + 1)                        # exp + reciprocal
    bytes_accessed = 4 * (2 * x.size + bias.size
                          + wq.size + wk.size + wv.size + wo.size
                          + bq.size + bk.size + bv.size + bo.size
                          + B * L * out_size + B * L * H * L)

    grid_spec = pltpu.PrefetchScalarGridSpec(
        num_scalar_prefetch=0,
        grid=(B,),
        in_specs=[
            pl.BlockSpec((pl.Squeezed(), L, Din), lambda b: (b, 0, 0)),      # x
            pl.BlockSpec((pl.Squeezed(), Din, L), lambda b: (b, 0, 0)),      # x^T
            pl.BlockSpec((pl.Squeezed(), L, L), lambda b: (b, 0, 0)),        # mask bias
            pl.BlockSpec((Din, key_size), lambda b: (0, 0)),                 # Wq^T
            pl.BlockSpec((1, key_size), lambda b: (0, 0)),                   # bq
            pl.BlockSpec((key_size, Din), lambda b: (0, 0)),                 # Wk (row form)
            pl.BlockSpec((key_size, 1), lambda b: (0, 0)),                   # bk (column)
            pl.BlockSpec((Din, value_size), lambda b: (0, 0)),               # Wv^T
            pl.BlockSpec((1, value_size), lambda b: (0, 0)),                 # bv
            pl.BlockSpec((value_size, out_size), lambda b: (0, 0)),          # Wo^T
            pl.BlockSpec((1, out_size), lambda b: (0, 0)),                   # bo
        ],
        out_specs=(
            pl.BlockSpec((pl.Squeezed(), L, out_size), lambda b: (b, 0, 0)),  # ans
            pl.BlockSpec((pl.Squeezed(), L, H * L), lambda b: (b, 0, 0)),     # attn slab
        ),
        scratch_shapes=[
            pltpu.VMEM((key_size, H * L), jnp.float32),      # block-diagonal K^T
            pltpu.VMEM((H * L, value_size), jnp.float32),    # block-diagonal V
        ],
    )

    ans, attn_slab = pl.pallas_call(
        kernel,
        out_shape=(
            jax.ShapeDtypeStruct((B, L, out_size), jnp.float32),
            jax.ShapeDtypeStruct((B, L, H * L), jnp.float32),
        ),
        grid_spec=grid_spec,
        compiler_params=pltpu.CompilerParams(
            dimension_semantics=("parallel",)),
        cost_estimate=pl.CostEstimate(flops=int(flops),
                                      transcendentals=int(transcendentals),
                                      bytes_accessed=int(bytes_accessed)),
    )(x, xt, bias, wqT, bq2, wk, bkT, wvT, bv2, woT, bo2)

    # Reassemble the lane-dense (B, L, H*L) slab into the module's (B, H, L, L)
    # layout.  TODO(synk): at large L, consume the reshape-only (B, L, H, L) layout
    # downstream to skip this extra XLA transpose pass over the probabilities.
    attn = attn_slab.reshape(B, L, H, L).transpose(0, 2, 1, 3)
    return ans, attn


def reference(x, bias, params, H):
    # Pure-JAX replica of the PyTorch forward (dropout in eval mode).
    B, L, _ = x.shape
    q = x @ params["wq"].T + params["bq"]
    k = x @ params["wk"].T + params["bk"]
    v = x @ params["wv"].T + params["bv"]
    dh = params["wq"].shape[0] // H
    dv = params["wv"].shape[0] // H

    def split(t, d):
        return t.reshape(B, L, H, d).transpose(0, 2, 1, 3)

    qh, kh, vh = split(q, dh), split(k, dh), split(v, dv)
    qh = qh / math.sqrt(dh)
    logits = jnp.einsum("bhqd,bhkd->bhqk", qh, kh) + bias[:, None, :, :]
    attn = jax.nn.softmax(logits, axis=-1)
    ctx = jnp.einsum("bhqk,bhkd->bhqd", attn, vh)
    ctx = ctx.transpose(0, 2, 1, 3).reshape(B, L, H * dv)
    ans = ctx @ params["wo"].T + params["bo"]
    return ans, attn


if __name__ == "__main__":
    # Small shapes consistent with the module.
    B, L = 2, 16
    input_size, key_size, value_size, output_size = 32, 64, 64, 32
    num_heads = 8

    root = jax.random.PRNGKey(0)
    keys = jax.random.split(root, 12)
    params = {
        "wq": 0.1 * jax.random.normal(keys[0], (key_size, input_size), jnp.float32),
        "bq": 0.1 * jax.random.normal(keys[1], (key_size,), jnp.float32),
        "wk": 0.1 * jax.random.normal(keys[2], (key_size, input_size), jnp.float32),
        "bk": 0.1 * jax.random.normal(keys[3], (key_size,), jnp.float32),
        "wv": 0.1 * jax.random.normal(keys[4], (value_size, input_size), jnp.float32),
        "bv": 0.1 * jax.random.normal(keys[5], (value_size,), jnp.float32),
        "wo": 0.1 * jax.random.normal(keys[6], (output_size, value_size), jnp.float32),
        "bo": 0.1 * jax.random.normal(keys[7], (output_size,), jnp.float32),
    }
    x = jax.random.normal(keys[8], (B, L, input_size), jnp.float32)
    # Padding-mask-style additive bias, [batch, length, length].
    bias = jnp.where(jax.random.uniform(keys[9], (B, L, L)) > 0.8, -1e9, 0.0).astype(jnp.float32)

    ans, attn = multihead_attention(x, bias, params, num_heads)
    jax.block_until_ready((ans, attn))

    ans_exp, attn_exp = reference(x, bias, params, num_heads)
    assert ans.shape == (B, L, output_size) and attn.shape == (B, num_heads, L, L)
    assert jnp.allclose(ans, ans_exp, atol=1e-4, rtol=1e-4)
    assert jnp.allclose(attn, attn_exp, atol=1e-4, rtol=1e-4)
    print("KERNEL_OK")
</pallas_src>

<mosaic_0001>
module attributes {stable_mosaic.version = 11 : i64} {
  func.func @mha_kernel(%arg0: i32, %arg1: memref<1x16x32xf32, #tpu.memory_space<vmem>>, %arg2: memref<1x32x16xf32, #tpu.memory_space<vmem>>, %arg3: memref<1x16x16xf32, #tpu.memory_space<vmem>>, %arg4: memref<32x64xf32, #tpu.memory_space<vmem>>, %arg5: memref<1x64xf32, #tpu.memory_space<vmem>>, %arg6: memref<64x32xf32, #tpu.memory_space<vmem>>, %arg7: memref<64x1xf32, #tpu.memory_space<vmem>>, %arg8: memref<32x64xf32, #tpu.memory_space<vmem>>, %arg9: memref<1x64xf32, #tpu.memory_space<vmem>>, %arg10: memref<64x32xf32, #tpu.memory_space<vmem>>, %arg11: memref<1x32xf32, #tpu.memory_space<vmem>>, %arg12: memref<1x16x32xf32, #tpu.memory_space<vmem>>, %arg13: memref<1x16x128xf32, #tpu.memory_space<vmem>>, %arg14: memref<64x128xf32, #tpu.memory_space<vmem>>, %arg15: memref<128x64xf32, #tpu.memory_space<vmem>>) attributes {dimension_semantics = [#tpu.dimension_semantics<parallel>], iteration_bounds = array<i64: 2>, scalar_prefetch = 0 : i64, scratch_operands = 2 : i64, tpu.core_type = #tpu.core_type<tc>, window_params = [{transform_indices = @transform_0, window_bounds = array<i64: 1, 16, 32>}, {transform_indices = @transform_1, window_bounds = array<i64: 1, 32, 16>}, {transform_indices = @transform_2, window_bounds = array<i64: 1, 16, 16>}, {pipeline_mode = #tpu.pipeline_mode<synchronous>, transform_indices = @transform_3, window_bounds = array<i64: 32, 64>}, {pipeline_mode = #tpu.pipeline_mode<synchronous>, transform_indices = @transform_4, window_bounds = array<i64: 1, 64>}, {pipeline_mode = #tpu.pipeline_mode<synchronous>, transform_indices = @transform_5, window_bounds = array<i64: 64, 32>}, {pipeline_mode = #tpu.pipeline_mode<synchronous>, transform_indices = @transform_6, window_bounds = array<i64: 64, 1>}, {pipeline_mode = #tpu.pipeline_mode<synchronous>, transform_indices = @transform_7, window_bounds = array<i64: 32, 64>}, {pipeline_mode = #tpu.pipeline_mode<synchronous>, transform_indices = @transform_8, window_bounds = array<i64: 1, 64>}, {pipeline_mode = #tpu.pipeline_mode<synchronous>, transform_indices = @transform_9, window_bounds = array<i64: 64, 32>}, {pipeline_mode = #tpu.pipeline_mode<synchronous>, transform_indices = @transform_10, window_bounds = array<i64: 1, 32>}, {transform_indices = @transform_11, window_bounds = array<i64: 1, 16, 32>}, {transform_indices = @transform_12, window_bounds = array<i64: 1, 16, 128>}]} {
    %c0 = arith.constant 0 : index
    %c0_0 = arith.constant 0 : index
    %c0_1 = arith.constant 0 : index
    %0 = vector.load %arg1[%c0, %c0_0, %c0_1] : memref<1x16x32xf32, #tpu.memory_space<vmem>>, vector<1x16x32xf32>
    %1 = vector.shape_cast %0 : vector<1x16x32xf32> to vector<16x32xf32>
    %c0_2 = arith.constant 0 : index
    %c0_3 = arith.constant 0 : index
    %c0_4 = arith.constant 0 : index
    %2 = vector.load %arg2[%c0_2, %c0_3, %c0_4] : memref<1x32x16xf32, #tpu.memory_space<vmem>>, vector<1x32x16xf32>
    %3 = vector.shape_cast %2 : vector<1x32x16xf32> to vector<32x16xf32>
    %c0_5 = arith.constant 0 : index
    %c0_6 = arith.constant 0 : index
    %c0_7 = arith.constant 0 : index
    %4 = vector.load %arg3[%c0_5, %c0_6, %c0_7] : memref<1x16x16xf32, #tpu.memory_space<vmem>>, vector<1x16x16xf32>
    %5 = vector.shape_cast %4 : vector<1x16x16xf32> to vector<16x16xf32>
    %c0_8 = arith.constant 0 : index
    %c0_9 = arith.constant 0 : index
    %6 = vector.load %arg4[%c0_8, %c0_9] : memref<32x64xf32, #tpu.memory_space<vmem>>, vector<32x64xf32>
    %cst = arith.constant dense<0.000000e+00> : vector<16x64xf32>
    %7 = tpu.matmul %1, %6, %cst {dimension_numbers = #tpu.dot_dimension_numbers<[1], [0], [0], [1], [0, 0, 1, 1], [], []>} : vector<16x32xf32>, vector<32x64xf32>, vector<16x64xf32> -> vector<16x64xf32>
    %c0_10 = arith.constant 0 : index
    %c0_11 = arith.constant 0 : index
    %8 = vector.load %arg5[%c0_10, %c0_11] : memref<1x64xf32, #tpu.memory_space<vmem>>, vector<1x64xf32>
    %9 = vector.broadcast %8 : vector<1x64xf32> to vector<16x64xf32>
    %10 = arith.addf %7, %9 : vector<16x64xf32>
    %cst_12 = arith.constant 0.353553385 : f32
    %11 = vector.broadcast %cst_12 : f32 to vector<16x64xf32>
    %12 = arith.mulf %10, %11 : vector<16x64xf32>
    %c0_13 = arith.constant 0 : index
    %c0_14 = arith.constant 0 : index
    %13 = vector.load %arg6[%c0_13, %c0_14] : memref<64x32xf32, #tpu.memory_space<vmem>>, vector<64x32xf32>
    %cst_15 = arith.constant dense<0.000000e+00> : vector<64x16xf32>
    %14 = tpu.matmul %13, %3, %cst_15 {dimension_numbers = #tpu.dot_dimension_numbers<[1], [0], [0], [1], [0, 0, 1, 1], [], []>} : vector<64x32xf32>, vector<32x16xf32>, vector<64x16xf32> -> vector<64x16xf32>
    %c0_16 = arith.constant 0 : index
    %c0_17 = arith.constant 0 : index
    %15 = vector.load %arg7[%c0_16, %c0_17] : memref<64x1xf32, #tpu.memory_space<vmem>>, vector<64x1xf32>
    %16 = vector.broadcast %15 : vector<64x1xf32> to vector<64x16xf32>
    %17 = arith.addf %14, %16 : vector<64x16xf32>
    %c0_18 = arith.constant 0 : index
    %c0_19 = arith.constant 0 : index
    %18 = vector.load %arg8[%c0_18, %c0_19] : memref<32x64xf32, #tpu.memory_space<vmem>>, vector<32x64xf32>
    %cst_20 = arith.constant dense<0.000000e+00> : vector<16x64xf32>
    %19 = tpu.matmul %1, %18, %cst_20 {dimension_numbers = #tpu.dot_dimension_numbers<[1], [0], [0], [1], [0, 0, 1, 1], [], []>} : vector<16x32xf32>, vector<32x64xf32>, vector<16x64xf32> -> vector<16x64xf32>
    %c0_21 = arith.constant 0 : index
    %c0_22 = arith.constant 0 : index
    %20 = vector.load %arg9[%c0_21, %c0_22] : memref<1x64xf32, #tpu.memory_space<vmem>>, vector<1x64xf32>
    %21 = vector.broadcast %20 : vector<1x64xf32> to vector<16x64xf32>
    %22 = arith.addf %19, %21 : vector<16x64xf32>
    %cst_23 = arith.constant 0.000000e+00 : f32
    %23 = vector.broadcast %cst_23 : f32 to vector<64x128xf32>
    %c0_24 = arith.constant 0 : index
    %c0_25 = arith.constant 0 : index
    %24 = vector.load %arg14[%c0_24, %c0_25] : memref<64x128xf32, #tpu.memory_space<vmem>>, vector<64x128xf32>
    tpu.vector_store %arg14[%c0_24, %c0_25], %23 {strides = array<i32>} : memref<64x128xf32, #tpu.memory_space<vmem>>, vector<64x128xf32>,
    %cst_26 = arith.constant 0.000000e+00 : f32
    %25 = vector.broadcast %cst_26 : f32 to vector<128x64xf32>
    %c0_27 = arith.constant 0 : index
    %c0_28 = arith.constant 0 : index
    %26 = vector.load %arg15[%c0_27, %c0_28] : memref<128x64xf32, #tpu.memory_space<vmem>>, vector<128x64xf32>
    tpu.vector_store %arg15[%c0_27, %c0_28], %25 {strides = array<i32>} : memref<128x64xf32, #tpu.memory_space<vmem>>, vector<128x64xf32>,
    %27 = vector.extract_strided_slice %17 {offsets = [0, 0], sizes = [8, 16], strides = [1, 1]} : vector<64x16xf32> to vector<8x16xf32>
    %c0_29 = arith.constant 0 : index
    %c0_30 = arith.constant 0 : index
    %28 = vector.load %arg14[%c0_29, %c0_30] : memref<64x128xf32, #tpu.memory_space<vmem>>, vector<8x16xf32>
    tpu.vector_store %arg14[%c0_29, %c0_30], %27 {strides = array<i32>} : memref<64x128xf32, #tpu.memory_space<vmem>>, vector<8x16xf32>,
    %29 = vector.extract_strided_slice %22 {offsets = [0, 0], sizes = [16, 8], strides = [1, 1]} : vector<16x64xf32> to vector<16x8xf32>
    %c0_31 = arith.constant 0 : index
    %c0_32 = arith.constant 0 : index
    %30 = vector.load %arg15[%c0_31, %c0_32] : memref<128x64xf32, #tpu.memory_space<vmem>>, vector<16x8xf32>
    tpu.vector_store %arg15[%c0_31, %c0_32], %29 {strides = array<i32>} : memref<128x64xf32, #tpu.memory_space<vmem>>, vector<16x8xf32>,
    %31 = vector.extract_strided_slice %17 {offsets = [8, 0], sizes = [8, 16], strides = [1, 1]} : vector<64x16xf32> to vector<8x16xf32>
    %c8 = arith.constant 8 : index
    %c16 = arith.constant 16 : index
    %32 = vector.load %arg14[%c8, %c16] : memref<64x128xf32, #tpu.memory_space<vmem>>, vector<8x16xf32>
    tpu.vector_store %arg14[%c8, %c16], %31 {strides = array<i32>} : memref<64x128xf32, #tpu.memory_space<vmem>>, vector<8x16xf32>,
    %33 = vector.extract_strided_slice %22 {offsets = [0, 8], sizes = [16, 8], strides = [1, 1]} : vector<16x64xf32> to vector<16x8xf32>
    %c16_33 = arith.constant 16 : index
    %c8_34 = arith.constant 8 : index
    %34 = vector.load %arg15[%c16_33, %c8_34] : memref<128x64xf32, #tpu.memory_space<vmem>>, vector<16x8xf32>
    tpu.vector_store %arg15[%c16_33, %c8_34], %33 {strides = array<i32>} : memref<128x64xf32, #tpu.memory_space<vmem>>, vector<16x8xf32>,
    %35 = vector.extract_strided_slice %17 {offsets = [16, 0], sizes = [8, 16], strides = [1, 1]} : vector<64x16xf32> to vector<8x16xf32>
    %c16_35 = arith.constant 16 : index
    %c32 = arith.constant 32 : index
    %36 = vector.load %arg14[%c16_35, %c32] : memref<64x128xf32, #tpu.memory_space<vmem>>, vector<8x16xf32>
    tpu.vector_store %arg14[%c16_35, %c32], %35 {strides = array<i32>} : memref<64x128xf32, #tpu.memory_space<vmem>>, vector<8x16xf32>,
    %37 = vector.extract_strided_slice %22 {offsets = [0, 16], sizes = [16, 8], strides = [1, 1]} : vector<16x64xf32> to vector<16x8xf32>
    %c32_36 = arith.constant 32 : index
    %c16_37 = arith.constant 16 : index
    %38 = vector.load %arg15[%c32_36, %c16_37] : memref<128x64xf32, #tpu.memory_space<vmem>>, vector<16x8xf32>
    tpu.vector_store %arg15[%c32_36, %c16_37], %37 {strides = array<i32>} : memref<128x64xf32, #tpu.memory_space<vmem>>, vector<16x8xf32>,
    %39 = vector.extract_strided_slice %17 {offsets = [24, 0], sizes = [8, 16], strides = [1, 1]} : vector<64x16xf32> to vector<8x16xf32>
    %c24 = arith.constant 24 : index
    %c48 = arith.constant 48 : index
    %40 = vector.load %arg14[%c24, %c48] : memref<64x128xf32, #tpu.memory_space<vmem>>, vector<8x16xf32>
    tpu.vector_store %arg14[%c24, %c48], %39 {strides = array<i32>} : memref<64x128xf32, #tpu.memory_space<vmem>>, vector<8x16xf32>,
    %41 = vector.extract_strided_slice %22 {offsets = [0, 24], sizes = [16, 8], strides = [1, 1]} : vector<16x64xf32> to vector<16x8xf32>
    %c48_38 = arith.constant 48 : index
    %c24_39 = arith.constant 24 : index
    %42 = vector.load %arg15[%c48_38, %c24_39] : memref<128x64xf32, #tpu.memory_space<vmem>>, vector<16x8xf32>
    tpu.vector_store %arg15[%c48_38, %c24_39], %41 {strides = array<i32>} : memref<128x64xf32, #tpu.memory_space<vmem>>, vector<16x8xf32>,
    %43 = vector.extract_strided_slice %17 {offsets = [32, 0], sizes = [8, 16], strides = [1, 1]} : vector<64x16xf32> to vector<8x16xf32>
    %c32_40 = arith.constant 32 : index
    %c64 = arith.constant 64 : index
    %44 = vector.load %arg14[%c32_40, %c64] : memref<64x128xf32, #tpu.memory_space<vmem>>, vector<8x16xf32>
    tpu.vector_store %arg14[%c32_40, %c64], %43 {strides = array<i32>} : memref<64x128xf32, #tpu.memory_space<vmem>>, vector<8x16xf32>,
    %45 = vector.extract_strided_slice %22 {offsets = [0, 32], sizes = [16, 8], strides = [1, 1]} : vector<16x64xf32> to vector<16x8xf32>
    %c64_41 = arith.constant 64 : index
    %c32_42 = arith.constant 32 : index
    %46 = vector.load %arg15[%c64_41, %c32_42] : memref<128x64xf32, #tpu.memory_space<vmem>>, vector<16x8xf32>
    tpu.vector_store %arg15[%c64_41, %c32_42], %45 {strides = array<i32>} : memref<128x64xf32, #tpu.memory_space<vmem>>, vector<16x8xf32>,
    %47 = vector.extract_strided_slice %17 {offsets = [40, 0], sizes = [8, 16], strides = [1, 1]} : vector<64x16xf32> to vector<8x16xf32>
    %c40 = arith.constant 40 : index
    %c80 = arith.constant 80 : index
    %48 = vector.load %arg14[%c40, %c80] : memref<64x128xf32, #tpu.memory_space<vmem>>, vector<8x16xf32>
    tpu.vector_store %arg14[%c40, %c80], %47 {strides = array<i32>} : memref<64x128xf32, #tpu.memory_space<vmem>>, vector<8x16xf32>,
    %49 = vector.extract_strided_slice %22 {offsets = [0, 40], sizes = [16, 8], strides = [1, 1]} : vector<16x64xf32> to vector<16x8xf32>
    %c80_43 = arith.constant 80 : index
    %c40_44 = arith.constant 40 : index
    %50 = vector.load %arg15[%c80_43, %c40_44] : memref<128x64xf32, #tpu.memory_space<vmem>>, vector<16x8xf32>
    tpu.vector_store %arg15[%c80_43, %c40_44], %49 {strides = array<i32>} : memref<128x64xf32, #tpu.memory_space<vmem>>, vector<16x8xf32>,
    %51 = vector.extract_strided_slice %17 {offsets = [48, 0], sizes = [8, 16], strides = [1, 1]} : vector<64x16xf32> to vector<8x16xf32>
    %c48_45 = arith.constant 48 : index
    %c96 = arith.constant 96 : index
    %52 = vector.load %arg14[%c48_45, %c96] : memref<64x128xf32, #tpu.memory_space<vmem>>, vector<8x16xf32>
    tpu.vector_store %arg14[%c48_45, %c96], %51 {strides = array<i32>} : memref<64x128xf32, #tpu.memory_space<vmem>>, vector<8x16xf32>,
    %53 = vector.extract_strided_slice %22 {offsets = [0, 48], sizes = [16, 8], strides = [1, 1]} : vector<16x64xf32> to vector<16x8xf32>
    %c96_46 = arith.constant 96 : index
    %c48_47 = arith.constant 48 : index
    %54 = vector.load %arg15[%c96_46, %c48_47] : memref<128x64xf32, #tpu.memory_space<vmem>>, vector<16x8xf32>
    tpu.vector_store %arg15[%c96_46, %c48_47], %53 {strides = array<i32>} : memref<128x64xf32, #tpu.memory_space<vmem>>, vector<16x8xf32>,
    %55 = vector.extract_strided_slice %17 {offsets = [56, 0], sizes = [8, 16], strides = [1, 1]} : vector<64x16xf32> to vector<8x16xf32>
    %c56 = arith.constant 56 : index
    %c112 = arith.constant 112 : index
    %56 = vector.load %arg14[%c56, %c112] : memref<64x128xf32, #tpu.memory_space<vmem>>, vector<8x16xf32>
    tpu.vector_store %arg14[%c56, %c112], %55 {strides = array<i32>} : memref<64x128xf32, #tpu.memory_space<vmem>>, vector<8x16xf32>,
    %57 = vector.extract_strided_slice %22 {offsets = [0, 56], sizes = [16, 8], strides = [1, 1]} : vector<16x64xf32> to vector<16x8xf32>
    %c112_48 = arith.constant 112 : index
    %c56_49 = arith.constant 56 : index
    %58 = vector.load %arg15[%c112_48, %c56_49] : memref<128x64xf32, #tpu.memory_space<vmem>>, vector<16x8xf32>
    tpu.vector_store %arg15[%c112_48, %c56_49], %57 {strides = array<i32>} : memref<128x64xf32, #tpu.memory_space<vmem>>, vector<16x8xf32>,
    %c0_50 = arith.constant 0 : index
    %c0_51 = arith.constant 0 : index
    %59 = vector.load %arg14[%c0_50, %c0_51] : memref<64x128xf32, #tpu.memory_space<vmem>>, vector<64x128xf32>
    %cst_52 = arith.constant dense<0.000000e+00> : vector<16x128xf32>
    %60 = tpu.matmul %12, %59, %cst_52 {dimension_numbers = #tpu.dot_dimension_numbers<[1], [0], [0], [1], [0, 0, 1, 1], [], []>} : vector<16x64xf32>, vector<64x128xf32>, vector<16x128xf32> -> vector<16x128xf32>
    %61 = vector.extract_strided_slice %60 {offsets = [0, 0], sizes = [16, 16], strides = [1, 1]} : vector<16x128xf32> to vector<16x16xf32>
    %62 = arith.addf %61, %5 : vector<16x16xf32>
    %cst_53 = arith.constant dense<0xFF800000> : vector<16xf32>
    %63 = vector.multi_reduction <maximumf>, %62, %cst_53 [1] : vector<16x16xf32> to vector<16xf32>
    %64 = vector.shape_cast %63 : vector<16xf32> to vector<16x1xf32>
    %65 = vector.broadcast %64 : vector<16x1xf32> to vector<16x16xf32>
    %66 = arith.subf %62, %65 : vector<16x16xf32>
    %67 = math.exp %66 : vector<16x16xf32>
    %cst_54 = arith.constant dense<0.000000e+00> : vector<16xf32>
    %68 = vector.multi_reduction <add>, %67, %cst_54 [1] : vector<16x16xf32> to vector<16xf32>
    %69 = vector.shape_cast %68 : vector<16xf32> to vector<16x1xf32>
    %70 = tpu.reciprocal %69 {approx = true} : vector<16x1xf32> -> vector<16x1xf32>
    %71 = arith.mulf %69, %70 : vector<16x1xf32>
    %cst_55 = arith.constant 2.000000e+00 : f32
    %72 = vector.broadcast %cst_55 : f32 to vector<16x1xf32>
    %73 = arith.subf %72, %71 : vector<16x1xf32>
    %74 = arith.mulf %70, %73 : vector<16x1xf32>
    %75 = vector.broadcast %74 : vector<16x1xf32> to vector<16x16xf32>
    %76 = arith.mulf %67, %75 : vector<16x16xf32>
    %c0_56 = arith.constant 0 : index
    %c0_57 = arith.constant 0 : index
    %c0_58 = arith.constant 0 : index
    %77 = vector.load %arg13[%c0_56, %c0_57, %c0_58] : memref<1x16x128xf32, #tpu.memory_space<vmem>>, vector<1x16x16xf32>
    %78 = vector.shape_cast %77 : vector<1x16x16xf32> to vector<16x16xf32>
    %79 = vector.shape_cast %76 : vector<16x16xf32> to vector<1x16x16xf32>
    tpu.vector_store %arg13[%c0_56, %c0_57, %c0_58], %79 {strides = array<i32>} : memref<1x16x128xf32, #tpu.memory_space<vmem>>, vector<1x16x16xf32>,
    %80 = vector.extract_strided_slice %60 {offsets = [0, 16], sizes = [16, 16], strides = [1, 1]} : vector<16x128xf32> to vector<16x16xf32>
    %81 = arith.addf %80, %5 : vector<16x16xf32>
    %cst_59 = arith.constant dense<0xFF800000> : vector<16xf32>
    %82 = vector.multi_reduction <maximumf>, %81, %cst_59 [1] : vector<16x16xf32> to vector<16xf32>
    %83 = vector.shape_cast %82 : vector<16xf32> to vector<16x1xf32>
    %84 = vector.broadcast %83 : vector<16x1xf32> to vector<16x16xf32>
    %85 = arith.subf %81, %84 : vector<16x16xf32>
    %86 = math.exp %85 : vector<16x16xf32>
    %cst_60 = arith.constant dense<0.000000e+00> : vector<16xf32>
    %87 = vector.multi_reduction <add>, %86, %cst_60 [1] : vector<16x16xf32> to vector<16xf32>
    %88 = vector.shape_cast %87 : vector<16xf32> to vector<16x1xf32>
    %89 = tpu.reciprocal %88 {approx = true} : vector<16x1xf32> -> vector<16x1xf32>
    %90 = arith.mulf %88, %89 : vector<16x1xf32>
    %cst_61 = arith.constant 2.000000e+00 : f32
    %91 = vector.broadcast %cst_61 : f32 to vector<16x1xf32>
    %92 = arith.subf %91, %90 : vector<16x1xf32>
    %93 = arith.mulf %89, %92 : vector<16x1xf32>
    %94 = vector.broadcast %93 : vector<16x1xf32> to vector<16x16xf32>
    %95 = arith.mulf %86, %94 : vector<16x16xf32>
    %c0_62 = arith.constant 0 : index
    %c0_63 = arith.constant 0 : index
    %c16_64 = arith.constant 16 : index
    %96 = vector.load %arg13[%c0_62, %c0_63, %c16_64] : memref<1x16x128xf32, #tpu.memory_space<vmem>>, vector<1x16x16xf32>
    %97 = vector.shape_cast %96 : vector<1x16x16xf32> to vector<16x16xf32>
    %98 = vector.shape_cast %95 : vector<16x16xf32> to vector<1x16x16xf32>
    tpu.vector_store %arg13[%c0_62, %c0_63, %c16_64], %98 {strides = array<i32>} : memref<1x16x128xf32, #tpu.memory_space<vmem>>, vector<1x16x16xf32>,
    %99 = vector.extract_strided_slice %60 {offsets = [0, 32], sizes = [16, 16], strides = [1, 1]} : vector<16x128xf32> to vector<16x16xf32>
    %100 = arith.addf %99, %5 : vector<16x16xf32>
    %cst_65 = arith.constant dense<0xFF800000> : vector<16xf32>
    %101 = vector.multi_reduction <maximumf>, %100, %cst_65 [1] : vector<16x16xf32> to vector<16xf32>
    %102 = vector.shape_cast %101 : vector<16xf32> to vector<16x1xf32>
    %103 = vector.broadcast %102 : vector<16x1xf32> to vector<16x16xf32>
    %104 = arith.subf %100, %103 : vector<16x16xf32>
    %105 = math.exp %104 : vector<16x16xf32>
    %cst_66 = arith.constant dense<0.000000e+00> : vector<16xf32>
    %106 = vector.multi_reduction <add>, %105, %cst_66 [1] : vector<16x16xf32> to vector<16xf32>
    %107 = vector.shape_cast %106 : vector<16xf32> to vector<16x1xf32>
    %108 = tpu.reciprocal %107 {approx = true} : vector<16x1xf32> -> vector<16x1xf32>
    %109 = arith.mulf %107, %108 : vector<16x1xf32>
    %cst_67 = arith.constant 2.000000e+00 : f32
    %110 = vector.broadcast %cst_67 : f32 to vector<16x1xf32>
    %111 = arith.subf %110, %109 : vector<16x1xf32>
    %112 = arith.mulf %108, %111 : vector<16x1xf32>
    %113 = vector.broadcast %112 : vector<16x1xf32> to vector<16x16xf32>
    %114 = arith.mulf %105, %113 : vector<16x16xf32>
    %c0_68 = arith.constant 0 : index
    %c0_69 = arith.constant 0 : index
    %c32_70 = arith.constant 32 : index
    %115 = vector.load %arg13[%c0_68, %c0_69, %c32_70] : memref<1x16x128xf32, #tpu.memory_space<vmem>>, vector<1x16x16xf32>
    %116 = vector.shape_cast %115 : vector<1x16x16xf32> to vector<16x16xf32>
    %117 = vector.shape_cast %114 : vector<16x16xf32> to vector<1x16x16xf32>
    tpu.vector_store %arg13[%c0_68, %c0_69, %c32_70], %117 {strides = array<i32>} : memref<1x16x128xf32, #tpu.memory_space<vmem>>, vector<1x16x16xf32>,
    %118 = vector.extract_strided_slice %60 {offsets = [0, 48], sizes = [16, 16], strides = [1, 1]} : vector<16x128xf32> to vector<16x16xf32>
    %119 = arith.addf %118, %5 : vector<16x16xf32>
    %cst_71 = arith.constant dense<0xFF800000> : vector<16xf32>
    %120 = vector.multi_reduction <maximumf>, %119, %cst_71 [1] : vector<16x16xf32> to vector<16xf32>
    %121 = vector.shape_cast %120 : vector<16xf32> to vector<16x1xf32>
    %122 = vector.broadcast %121 : vector<16x1xf32> to vector<16x16xf32>
    %123 = arith.subf %119, %122 : vector<16x16xf32>
    %124 = math.exp %123 : vector<16x16xf32>
    %cst_72 = arith.constant dense<0.000000e+00> : vector<16xf32>
    %125 = vector.multi_reduction <add>, %124, %cst_72 [1] : vector<16x16xf32> to vector<16xf32>
    %126 = vector.shape_cast %125 : vector<16xf32> to vector<16x1xf32>
    %127 = tpu.reciprocal %126 {approx = true} : vector<16x1xf32> -> vector<16x1xf32>
    %128 = arith.mulf %126, %127 : vector<16x1xf32>
    %cst_73 = arith.constant 2.000000e+00 : f32
    %129 = vector.broadcast %cst_73 : f32 to vector<16x1xf32>
    %130 = arith.subf %129, %128 : vector<16x1xf32>
    %131 = arith.mulf %127, %130 : vector<16x1xf32>
    %132 = vector.broadcast %131 : vector<16x1xf32> to vector<16x16xf32>
    %133 = arith.mulf %124, %132 : vector<16x16xf32>
    %c0_74 = arith.constant 0 : index
    %c0_75 = arith.constant 0 : index
    %c48_76 = arith.constant 48 : index
    %134 = vector.load %arg13[%c0_74, %c0_75, %c48_76] : memref<1x16x128xf32, #tpu.memory_space<vmem>>, vector<1x16x16xf32>
    %135 = vector.shape_cast %134 : vector<1x16x16xf32> to vector<16x16xf32>
    %136 = vector.shape_cast %133 : vector<16x16xf32> to vector<1x16x16xf32>
    tpu.vector_store %arg13[%c0_74, %c0_75, %c48_76], %136 {strides = array<i32>} : memref<1x16x128xf32, #tpu.memory_space<vmem>>, vector<1x16x16xf32>,
    %137 = vector.extract_strided_slice %60 {offsets = [0, 64], sizes = [16, 16], strides = [1, 1]} : vector<16x128xf32> to vector<16x16xf32>
    %138 = arith.addf %137, %5 : vector<16x16xf32>
    %cst_77 = arith.constant dense<0xFF800000> : vector<16xf32>
    %139 = vector.multi_reduction <maximumf>, %138, %cst_77 [1] : vector<16x16xf32> to vector<16xf32>
    %140 = vector.shape_cast %139 : vector<16xf32> to vector<16x1xf32>
    %141 = vector.broadcast %140 : vector<16x1xf32> to vector<16x16xf32>
    %142 = arith.subf %138, %141 : vector<16x16xf32>
    %143 = math.exp %142 : vector<16x16xf32>
    %cst_78 = arith.constant dense<0.000000e+00> : vector<16xf32>
    %144 = vector.multi_reduction <add>, %143, %cst_78 [1] : vector<16x16xf32> to vector<16xf32>
    %145 = vector.shape_cast %144 : vector<16xf32> to vector<16x1xf32>
    %146 = tpu.reciprocal %145 {approx = true} : vector<16x1xf32> -> vector<16x1xf32>
    %147 = arith.mulf %145, %146 : vector<16x1xf32>
    %cst_79 = arith.constant 2.000000e+00 : f32
    %148 = vector.broadcast %cst_79 : f32 to vector<16x1xf32>
    %149 = arith.subf %148, %147 : vector<16x1xf32>
    %150 = arith.mulf %146, %149 : vector<16x1xf32>
    %151 = vector.broadcast %150 : vector<16x1xf32> to vector<16x16xf32>
    %152 = arith.mulf %143, %151 : vector<16x16xf32>
    %c0_80 = arith.constant 0 : index
    %c0_81 = arith.constant 0 : index
    %c64_82 = arith.constant 64 : index
    %153 = vector.load %arg13[%c0_80, %c0_81, %c64_82] : memref<1x16x128xf32, #tpu.memory_space<vmem>>, vector<1x16x16xf32>
    %154 = vector.shape_cast %153 : vector<1x16x16xf32> to vector<16x16xf32>
    %155 = vector.shape_cast %152 : vector<16x16xf32> to vector<1x16x16xf32>
    tpu.vector_store %arg13[%c0_80, %c0_81, %c64_82], %155 {strides = array<i32>} : memref<1x16x128xf32, #tpu.memory_space<vmem>>, vector<1x16x16xf32>,
    %156 = vector.extract_strided_slice %60 {offsets = [0, 80], sizes = [16, 16], strides = [1, 1]} : vector<16x128xf32> to vector<16x16xf32>
    %157 = arith.addf %156, %5 : vector<16x16xf32>
    %cst_83 = arith.constant dense<0xFF800000> : vector<16xf32>
    %158 = vector.multi_reduction <maximumf>, %157, %cst_83 [1] : vector<16x16xf32> to vector<16xf32>
    %159 = vector.shape_cast %158 : vector<16xf32> to vector<16x1xf32>
    %160 = vector.broadcast %159 : vector<16x1xf32> to vector<16x16xf32>
    %161 = arith.subf %157, %160 : vector<16x16xf32>
    %162 = math.exp %161 : vector<16x16xf32>
    %cst_84 = arith.constant dense<0.000000e+00> : vector<16xf32>
    %163 = vector.multi_reduction <add>, %162, %cst_84 [1] : vector<16x16xf32> to vector<16xf32>
    %164 = vector.shape_cast %163 : vector<16xf32> to vector<16x1xf32>
    %165 = tpu.reciprocal %164 {approx = true} : vector<16x1xf32> -> vector<16x1xf32>
    %166 = arith.mulf %164, %165 : vector<16x1xf32>
    %cst_85 = arith.constant 2.000000e+00 : f32
    %167 = vector.broadcast %cst_85 : f32 to vector<16x1xf32>
    %168 = arith.subf %167, %166 : vector<16x1xf32>
    %169 = arith.mulf %165, %168 : vector<16x1xf32>
    %170 = vector.broadcast %169 : vector<16x1xf32> to vector<16x16xf32>
    %171 = arith.mulf %162, %170 : vector<16x16xf32>
    %c0_86 = arith.constant 0 : index
    %c0_87 = arith.constant 0 : index
    %c80_88 = arith.constant 80 : index
    %172 = vector.load %arg13[%c0_86, %c0_87, %c80_88] : memref<1x16x128xf32, #tpu.memory_space<vmem>>, vector<1x16x16xf32>
    %173 = vector.shape_cast %172 : vector<1x16x16xf32> to vector<16x16xf32>
    %174 = vector.shape_cast %171 : vector<16x16xf32> to vector<1x16x16xf32>
    tpu.vector_store %arg13[%c0_86, %c0_87, %c80_88], %174 {strides = array<i32>} : memref<1x16x128xf32, #tpu.memory_space<vmem>>, vector<1x16x16xf32>,
    %175 = vector.extract_strided_slice %60 {offsets = [0, 96], sizes = [16, 16], strides = [1, 1]} : vector<16x128xf32> to vector<16x16xf32>
    %176 = arith.addf %175, %5 : vector<16x16xf32>
    %cst_89 = arith.constant dense<0xFF800000> : vector<16xf32>
    %177 = vector.multi_reduction <maximumf>, %176, %cst_89 [1] : vector<16x16xf32> to vector<16xf32>
    %178 = vector.shape_cast %177 : vector<16xf32> to vector<16x1xf32>
    %179 = vector.broadcast %178 : vector<16x1xf32> to vector<16x16xf32>
    %180 = arith.subf %176, %179 : vector<16x16xf32>
    %181 = math.exp %180 : vector<16x16xf32>
    %cst_90 = arith.constant dense<0.000000e+00> : vector<16xf32>
    %182 = vector.multi_reduction <add>, %181, %cst_90 [1] : vector<16x16xf32> to vector<16xf32>
    %183 = vector.shape_cast %182 : vector<16xf32> to vector<16x1xf32>
    %184 = tpu.reciprocal %183 {approx = true} : vector<16x1xf32> -> vector<16x1xf32>
    %185 = arith.mulf %183, %184 : vector<16x1xf32>
    %cst_91 = arith.constant 2.000000e+00 : f32
    %186 = vector.broadcast %cst_91 : f32 to vector<16x1xf32>
    %187 = arith.subf %186, %185 : vector<16x1xf32>
    %188 = arith.mulf %184, %187 : vector<16x1xf32>
    %189 = vector.broadcast %188 : vector<16x1xf32> to vector<16x16xf32>
    %190 = arith.mulf %181, %189 : vector<16x16xf32>
    %c0_92 = arith.constant 0 : index
    %c0_93 = arith.constant 0 : index
    %c96_94 = arith.constant 96 : index
    %191 = vector.load %arg13[%c0_92, %c0_93, %c96_94] : memref<1x16x128xf32, #tpu.memory_space<vmem>>, vector<1x16x16xf32>
    %192 = vector.shape_cast %191 : vector<1x16x16xf32> to vector<16x16xf32>
    %193 = vector.shape_cast %190 : vector<16x16xf32> to vector<1x16x16xf32>
    tpu.vector_store %arg13[%c0_92, %c0_93, %c96_94], %193 {strides = array<i32>} : memref<1x16x128xf32, #tpu.memory_space<vmem>>, vector<1x16x16xf32>,
    %194 = vector.extract_strided_slice %60 {offsets = [0, 112], sizes = [16, 16], strides = [1, 1]} : vector<16x128xf32> to vector<16x16xf32>
    %195 = arith.addf %194, %5 : vector<16x16xf32>
    %cst_95 = arith.constant dense<0xFF800000> : vector<16xf32>
    %196 = vector.multi_reduction <maximumf>, %195, %cst_95 [1] : vector<16x16xf32> to vector<16xf32>
    %197 = vector.shape_cast %196 : vector<16xf32> to vector<16x1xf32>
    %198 = vector.broadcast %197 : vector<16x1xf32> to vector<16x16xf32>
    %199 = arith.subf %195, %198 : vector<16x16xf32>
    %200 = math.exp %199 : vector<16x16xf32>
    %cst_96 = arith.constant dense<0.000000e+00> : vector<16xf32>
    %201 = vector.multi_reduction <add>, %200, %cst_96 [1] : vector<16x16xf32> to vector<16xf32>
    %202 = vector.shape_cast %201 : vector<16xf32> to vector<16x1xf32>
    %203 = tpu.reciprocal %202 {approx = true} : vector<16x1xf32> -> vector<16x1xf32>
    %204 = arith.mulf %202, %203 : vector<16x1xf32>
    %cst_97 = arith.constant 2.000000e+00 : f32
    %205 = vector.broadcast %cst_97 : f32 to vector<16x1xf32>
    %206 = arith.subf %205, %204 : vector<16x1xf32>
    %207 = arith.mulf %203, %206 : vector<16x1xf32>
    %208 = vector.broadcast %207 : vector<16x1xf32> to vector<16x16xf32>
    %209 = arith.mulf %200, %208 : vector<16x16xf32>
    %c0_98 = arith.constant 0 : index
    %c0_99 = arith.constant 0 : index
    %c112_100 = arith.constant 112 : index
    %210 = vector.load %arg13[%c0_98, %c0_99, %c112_100] : memref<1x16x128xf32, #tpu.memory_space<vmem>>, vector<1x16x16xf32>
    %211 = vector.shape_cast %210 : vector<1x16x16xf32> to vector<16x16xf32>
    %212 = vector.shape_cast %209 : vector<16x16xf32> to vector<1x16x16xf32>
    tpu.vector_store %arg13[%c0_98, %c0_99, %c112_100], %212 {strides = array<i32>} : memref<1x16x128xf32, #tpu.memory_space<vmem>>, vector<1x16x16xf32>,
    %c0_101 = arith.constant 0 : index
    %c0_102 = arith.constant 0 : index
    %c0_103 = arith.constant 0 : index
    %213 = vector.load %arg13[%c0_101, %c0_102, %c0_103] : memref<1x16x128xf32, #tpu.memory_space<vmem>>, vector<1x16x128xf32>
    %214 = vector.shape_cast %213 : vector<1x16x128xf32> to vector<16x128xf32>
    %c0_104 = arith.constant 0 : index
    %c0_105 = arith.constant 0 : index
    %215 = vector.load %arg15[%c0_104, %c0_105] : memref<128x64xf32, #tpu.memory_space<vmem>>, vector<128x64xf32>
    %cst_106 = arith.constant dense<0.000000e+00> : vector<16x64xf32>
    %216 = tpu.matmul %214, %215, %cst_106 {dimension_numbers = #tpu.dot_dimension_numbers<[1], [0], [0], [1], [0, 0, 1, 1], [], []>} : vector<16x128xf32>, vector<128x64xf32>, vector<16x64xf32> -> vector<16x64xf32>
    %c0_107 = arith.constant 0 : index
    %c0_108 = arith.constant 0 : index
    %217 = vector.load %arg10[%c0_107, %c0_108] : memref<64x32xf32, #tpu.memory_space<vmem>>, vector<64x32xf32>
    %cst_109 = arith.constant dense<0.000000e+00> : vector<16x32xf32>
    %218 = tpu.matmul %216, %217, %cst_109 {dimension_numbers = #tpu.dot_dimension_numbers<[1], [0], [0], [1], [0, 0, 1, 1], [], []>} : vector<16x64xf32>, vector<64x32xf32>, vector<16x32xf32> -> vector<16x32xf32>
    %c0_110 = arith.constant 0 : index
    %c0_111 = arith.constant 0 : index
    %219 = vector.load %arg11[%c0_110, %c0_111] : memref<1x32xf32, #tpu.memory_space<vmem>>, vector<1x32xf32>
    %220 = vector.broadcast %219 : vector<1x32xf32> to vector<16x32xf32>
    %221 = arith.addf %218, %220 : vector<16x32xf32>
    %c0_112 = arith.constant 0 : index
    %c0_113 = arith.constant 0 : index
    %c0_114 = arith.constant 0 : index
    %222 = vector.load %arg12[%c0_112, %c0_113, %c0_114] : memref<1x16x32xf32, #tpu.memory_space<vmem>>, vector<1x16x32xf32>
    %223 = vector.shape_cast %222 : vector<1x16x32xf32> to vector<16x32xf32>
    %224 = vector.shape_cast %221 : vector<16x32xf32> to vector<1x16x32xf32>
    tpu.vector_store %arg12[%c0_112, %c0_113, %c0_114], %224 {strides = array<i32>} : memref<1x16x32xf32, #tpu.memory_space<vmem>>, vector<1x16x32xf32>,
    return
  }
  func.func @transform_0(%arg0: i32) -> (i32, i32, i32) {
    %c0_i32 = arith.constant 0 : i32
    %c0_i32_0 = arith.constant 0 : i32
    %c0_i32_1 = arith.constant 0 : i32
    return %arg0, %c0_i32, %c0_i32_0 : i32, i32, i32
  }
  func.func @transform_1(%arg0: i32) -> (i32, i32, i32) {
    %c0_i32 = arith.constant 0 : i32
    %c0_i32_0 = arith.constant 0 : i32
    %c0_i32_1 = arith.constant 0 : i32
    return %arg0, %c0_i32, %c0_i32_0 : i32, i32, i32
  }
  func.func @transform_2(%arg0: i32) -> (i32, i32, i32) {
    %c0_i32 = arith.constant 0 : i32
    %c0_i32_0 = arith.constant 0 : i32
    %c0_i32_1 = arith.constant 0 : i32
    return %arg0, %c0_i32, %c0_i32_0 : i32, i32, i32
  }
  func.func @transform_3(%arg0: i32) -> (i32, i32) {
    %c0_i32 = arith.constant 0 : i32
    %c0_i32_0 = arith.constant 0 : i32
    %c0_i32_1 = arith.constant 0 : i32
    return %c0_i32, %c0_i32_0 : i32, i32
  }
  func.func @transform_4(%arg0: i32) -> (i32, i32) {
    %c0_i32 = arith.constant 0 : i32
    %c0_i32_0 = arith.constant 0 : i32
    %c0_i32_1 = arith.constant 0 : i32
    return %c0_i32, %c0_i32_0 : i32, i32
  }
  func.func @transform_5(%arg0: i32) -> (i32, i32) {
    %c0_i32 = arith.constant 0 : i32
    %c0_i32_0 = arith.constant 0 : i32
    %c0_i32_1 = arith.constant 0 : i32
    return %c0_i32, %c0_i32_0 : i32, i32
  }
  func.func @transform_6(%arg0: i32) -> (i32, i32) {
    %c0_i32 = arith.constant 0 : i32
    %c0_i32_0 = arith.constant 0 : i32
    %c0_i32_1 = arith.constant 0 : i32
    return %c0_i32, %c0_i32_0 : i32, i32
  }
  func.func @transform_7(%arg0: i32) -> (i32, i32) {
    %c0_i32 = arith.constant 0 : i32
    %c0_i32_0 = arith.constant 0 : i32
    %c0_i32_1 = arith.constant 0 : i32
    return %c0_i32, %c0_i32_0 : i32, i32
  }
  func.func @transform_8(%arg0: i32) -> (i32, i32) {
    %c0_i32 = arith.constant 0 : i32
    %c0_i32_0 = arith.constant 0 : i32
    %c0_i32_1 = arith.constant 0 : i32
    return %c0_i32, %c0_i32_0 : i32, i32
  }
  func.func @transform_9(%arg0: i32) -> (i32, i32) {
    %c0_i32 = arith.constant 0 : i32
    %c0_i32_0 = arith.constant 0 : i32
    %c0_i32_1 = arith.constant 0 : i32
    return %c0_i32, %c0_i32_0 : i32, i32
  }
  func.func @transform_10(%arg0: i32) -> (i32, i32) {
    %c0_i32 = arith.constant 0 : i32
    %c0_i32_0 = arith.constant 0 : i32
    %c0_i32_1 = arith.constant 0 : i32
    return %c0_i32, %c0_i32_0 : i32, i32
  }
  func.func @transform_11(%arg0: i32) -> (i32, i32, i32) {
    %c0_i32 = arith.constant 0 : i32
    %c0_i32_0 = arith.constant 0 : i32
    %c0_i32_1 = arith.constant 0 : i32
    return %arg0, %c0_i32, %c0_i32_0 : i32, i32, i32
  }
  func.func @transform_12(%arg0: i32) -> (i32, i32, i32) {
    %c0_i32 = arith.constant 0 : i32
    %c0_i32_0 = arith.constant 0 : i32
    %c0_i32_1 = arith.constant 0 : i32
    return %arg0, %c0_i32, %c0_i32_0 : i32, i32, i32
  }
}

</mosaic_0001>

<bundles_post_ra>
// kernel: tpu_custom_call.1
= control target key start
LH: loop header
LB: loop body
LE: loop exit
PB: predicated region body
PF: predicated region fallthrough
CT: control target
= control target key end

     0   :  { %s2303_s0 = inlined_call_operand.vmem [shape: f32[2,16,32], index: 0, kind: input, shape index: {}]   ;;  %s2304_s1 = inlined_call_operand.vmem [shape: f32[2,32,16], index: 1, kind: input, shape index: {}]   ;;  %s2305_s2 = inlined_call_operand.vmem [shape: f32[2,16,16], index: 2, kind: input, shape index: {}]   ;;  %s2306_s3 = inlined_call_operand.vmem [shape: f32[32,64], index: 3, kind: input, shape index: {}]   ;;  %s2307_s4 = inlined_call_operand.vmem [shape: f32[1,64], index: 4, kind: input, shape index: {}]   ;;  %s2308_s5 = inlined_call_operand.vmem [shape: f32[64,32], index: 5, kind: input, shape index: {}]   ;;  %s2309_s6 = inlined_call_operand.vmem [shape: f32[64,1], index: 6, kind: input, shape index: {}]   ;;  %s2310_s7 = inlined_call_operand.vmem [shape: f32[32,64], index: 7, kind: input, shape index: {}]   ;;  %s2311_s8 = inlined_call_operand.vmem [shape: f32[1,64], index: 8, kind: input, shape index: {}]   ;;  %s2312_s9 = inlined_call_operand.vmem [shape: f32[64,32], index: 9, kind: input, shape index: {}]   ;;  %s2313_s10 = inlined_call_operand.vmem [shape: f32[1,32], index: 10, kind: input, shape index: {}]   ;;  %s2314_s11 = inlined_call_operand.hbm [shape: f32[2,16,32], index: 11, kind: output, shape index: {0}]   ;;  %s2315_s12 = inlined_call_operand.hbm [shape: f32[2,16,128], index: 12, kind: output, shape index: {1}]  }
   0x1   :  { %2317 = sst [smem:[#allocation11_spill]] %s2303_s0 }
   0x2   :  { %2318 = sst [smem:[#allocation12_spill]] %s2304_s1 }
   0x3   :  { %2319 = sst [smem:[#allocation13_spill]] %s2305_s2 }
   0x4   :  { %2320 = sst [smem:[#allocation14_spill]] %s2306_s3 }
   0x5   :  { %2321 = sst [smem:[#allocation15_spill]] %s2307_s4 }
   0x6   :  { %18 = vsyncpa [#allocation5], 0 }
   0x7   :  { %20 = vsyncpa [#allocation5 + $0x1], 0 }
   0x8   :  { %21 = vsyncpa [#allocation7], 0 }
   0x9   :  { %23 = vsyncpa [#allocation7 + $0x1], 0  ;;  %s1732_s21 = smov 0   ;;  %s1734_s22 = smov 0  }
   0xa   :  { %s1736_s23 = smov 0   ;;  %s1738_s24 = smov 0  }
   0xb LB: > { %s1753_s25 = sadd.s32 4294967295, %s1654_s24   ;;  %s1390_s26 = sadd.s32 4294967294, %s1654_s24   ;;  %s1654_s24 = sphi %s1738_s24, %s2335_s24   ;;  %s1650_s23 = sphi %s1736_s23, %s2334_s23   ;;  %s1646_s22 = sphi %s1734_s22, %s2333_s22   ;;  %s1642_s21 = sphi %s1732_s21, %s2332_s21  }
   0xc   : > { %s1757_s27 = sadd.s32 1, %s1654_s24   ;;  %s282_s28 = sadd.s32 1, %s1650_s23 }
   0xd   : > { %s279_s29 = ssub.s32 %s1654_s24, %s1757_s27  ;;  %p292_p0 = scmp.ne.s32.totalorder %s1650_s23, %s1646_s22 }
   0xe   : > { %p280_p1 = scmp.eq.s32.totalorder %s279_s29, 0  ;;  %p293_p2 = scmp.eq.s32.totalorder %s1753_s25, 1 }
   0xf   : > { %p298_p3 = scmp.ne.s32.totalorder %s1646_s22, %s1642_s21  ;;  %p299_p4 = scmp.eq.s32.totalorder %s1390_s26, 1 }
  0x10   : > { %s1768_s30 = scalar_select %p280_p1, %s1650_s23, %s282_s28  }
  0x11   : > { %p1770_p5 = por %p293_p2, %p292_p0  ;;  %p1774_p6 = por %p299_p4, %p298_p3 }
  0x12   : > { %2322 = sst [smem:[#allocation10_spill]] %s1768_s30  ;;  %p1393_p7 = scmp.ge.s32.totalorder %s1654_s24, 1 }
  0x13   : > { %p391_p8 = scmp.lt.s32.totalorder %s1654_s24, 3 }
  0x15   : > { %p392_p9 = pnand %p1393_p7, %p391_p8 }
  0x16   : > { %p448_p10 = scmp.lt.s32.totalorder (!%p392_p9), %s1753_s25, 1  ;;  %s2325_s1 = sld [smem:[#allocation12_spill]] (!%p392_p9) }
  0x17   : > { %395 = sbr.rel (%p392_p9) target bundleno = 1199 (0x4af), region = 64  ;;  %s2326_s3 = sld [smem:[#allocation14_spill]] (!%p392_p9) }
  0x18   : > { %s2327_s0 = sld [smem:[#allocation11_spill]] (!%p392_p9)  ;;  %s1657_s16 = smov (!%p392_p9), 80  }
  0x19   : > { %s1659_s18 = smov (!%p392_p9), 96   ;;  %s1660_s19 = smov (!%p392_p9), 32  }
  0x1a   : > { %s2328_s2 = sld [smem:[#allocation13_spill]] (!%p392_p9)  ;;  %s1661_s26 = smov (!%p392_p9), 112  }
  0x1b   : > { %s1662_s28 = smov (!%p392_p9), 48   ;;  %s2329_s4 = sld [smem:[#allocation15_spill]] (!%p392_p9) }
  0x1c   : > { %v526_v0 = vld [vmem:[%s2309_s6 + $0x38] sm:$0xff]  ;;  %v1656_v1 = vmov 0   ;;  %s1785_s17 = scalar_select %p448_p10, %s1753_s25, 1  ;;  %v524_v2 = vld [vmem:[%s2309_s6 + $0x28] sm:$0xff]  ;;  %v525_v5 = vld [vmem:[%s2309_s6 + $0x30] sm:$0xff]  ;;  %vm479_vm0 = vcmask 261120  }
  0x1d   : > { %1490 = vset.pattern.permute.xlu0 %v1656_v1  ;;  %1491 = vset.pattern.permute.xlu1 %v1656_v1  ;;  %v511_v8 = vld [vmem:[%s2308_s5] sm:$0xff]  ;;  %v516_v9 = vld [vmem:[%s2308_s5 + $0x28] sm:$0xff]  ;;  %v522_v11 = vld [vmem:[%s2309_s6 + $0x18] sm:$0xff]  ;;  %v1658_v33 = vmov 0.0   ;;  %vm742_vm1 = vcmask 917248   ;;  %vm715_vm2 = vcmask 523648  }
  0x1e   : > { %564 = vperm.xlu0 %1490, %v526_v0   ;;  %1492 = vset.pattern.permute.xlu2 %v1656_v1  ;;  %s1427_s20 = sshll.u32 %s1785_s17, 5  ;;  %v523_v10 = vld [vmem:[%s2309_s6 + $0x20] sm:$0xff]  ;;  %v520_v12 = vld [vmem:[%s2309_s6 + $0x8] sm:$0xff]  ;;  %v517_v14 = vld [vmem:[%s2308_s5 + $0x30] sm:$0xff]  ;;  %s1426_s15 = sshll.u32 %s1785_s17, 4  ;;  %669 = vst [vmem:[#allocation2 + $0x30] sm:$0xff] %v1658_v33 }
  0x1f   : > { %554 = vperm.xlu1 %1491, %v524_v2   ;;  %s457_s29 = scalar_lea.vmem %s2325_s1, %s1427_s20  ;;  %544 = vperm.xlu2 %1492, %v522_v11   ;;  %v512_v13 = vld [vmem:[%s2308_s5 + $0x8] sm:$0xff]  ;;  %v521_v15 = vld [vmem:[%s2309_s6 + $0x10] sm:$0xff]  ;;  %v518_v17 = vld [vmem:[%s2308_s5 + $0x38] sm:$0xff]  ;;  %s452_s30 = scalar_lea.vmem %s2327_s0, %s1426_s15  ;;  %663 = vst [vmem:[#allocation2] sm:$0xff] %v1658_v33  ;;  %vm733_vm3 = vcmask 786048   ;;  %vm697_vm4 = vcmask 261248  }
  0x20   : > { %v468_v3 = vld [vmem:[%s457_s29 + $0x18] sm:$0xff]  ;;  %v467_v4 = vld [vmem:[%s457_s29 + $0x10] sm:$0xff]  ;;  %v466_v6 = vld [vmem:[%s457_s29 + $0x8] sm:$0xff]  ;;  %664 = vst [vmem:[#allocation2 + $0x8] sm:$0xff] %v1658_v33  ;;  %s462_s20 = scalar_lea.vmem %s2328_s2, %s1426_s15  ;;  %s1664_s17 = smov 64   ;;  %vm706_vm5 = vcmask 392448  }
  0x21   : > { %603 = vmatpush.msra.mxu1 %v468_v3  ;;  %1431 = vmatpush.msra.mxu3 %v468_v3  ;;  %v465_v7 = vld [vmem:[%s457_s29] sm:$0xff]  ;;  %v513_v16 = vld [vmem:[%s2308_s5 + $0x10] sm:$0xff]  ;;  %v514_v18 = vld [vmem:[%s2308_s5 + $0x18] sm:$0xff]  ;;  %665 = vst [vmem:[#allocation2 + $0x10] sm:$0xff] %v1658_v33  ;;  %s1663_s29 = smov 16   ;;  %vm671_vm6 = vcmask 523264  }
  0x22   : > { %v515_v19 = vld [vmem:[%s2308_s5 + $0x20] sm:$0xff]  ;;  %v474_v20 = vld [vmem:[%s2326_s3 + $0x18] sm:$0xff]  ;;  %v473_v22 = vld [vmem:[%s2326_s3 + $0x10] sm:$0xff]  ;;  %666 = vst [vmem:[#allocation2 + $0x18] sm:$0xff] %v1658_v33  ;;  %vm751_vm7 = vcmask 1048448   ;;  %vm724_vm8 = vcmask 654848  }
  0x23   : > { %604 = vmatpush.msra.mxu1 %v467_v4  ;;  %1432 = vmatpush.msra.mxu3 %v467_v4  ;;  %v472_v24 = vld [vmem:[%s2326_s3 + $0x8] sm:$0xff]  ;;  %v471_v25 = vld [vmem:[%s2326_s3] sm:$0xff]  ;;  %667 = vst [vmem:[#allocation2 + $0x20] sm:$0xff] %v1658_v33  ;;  %vm688_vm9 = vcmask 130048   ;;  %vm753_vm10 = vcmask 523712   ;;  %vm744_vm11 = vcmask 458112  }
  0x24   : > { %498 = vmatpush.msra.mxu0 %v474_v20  ;;  %v1861_v28 = vld [vmem:[%s452_s30] sm:$0xff]  ;;  %v1866_v32 = vld [vmem:[%s452_s30 + $0x8] sm:$0xff]  ;;  %668 = vst [vmem:[#allocation2 + $0x28] sm:$0xff] %v1658_v33  ;;  %vm735_vm12 = vcmask 392512   ;;  %vm726_vm13 = vcmask 326912   ;;  %vm717_vm14 = vcmask 261312  }
  0x25   : > { %605 = vmatpush.msra.mxu1 %v466_v6  ;;  %1433 = vmatpush.msra.mxu3 %v466_v6  ;;  %670 = vst [vmem:[#allocation2 + $0x38] sm:$0xff] %v1658_v33  ;;  %v1885_v43 = vld [vmem:[%s462_s20] sm:$0xff]  ;;  %v1902_v51 = vld [vmem:[%s462_s20 + $0x8] sm:$0xff]  ;;  %vm708_vm15 = vcmask 195712  }
  0x26   : > { %559 = vperm.xlu0 %1490, %v525_v5   ;;  %499 = vmatpush.msra.mxu0 %v473_v22  ;;  %v519_v50 = vld [vmem:[%s2309_s6] sm:$0xff]  ;;  %672 = vst.msk [vmem:[#allocation3] sm:$0xff] %vm671_vm6, %v1658_v33 }
  0x27   : > { %606 = vmatpush.msra.mxu1 %v465_v7  ;;  %1434 = vmatpush.msra.mxu3 %v465_v7  ;;  %673 = vst.msk [vmem:[#allocation3 + $0x8] sm:$0xff] %vm671_vm6, %v1658_v33  ;;  %v1493_v0 = vld [vmem:[%s2329_s4] ss:$0 sm:$0xff] }
  0x28   : > { %1404 = vmatmul.msk.f32.vlgmr.msra.gmra.mxu1 %vm479_vm0, %v511_v8  ;;  %1409 = vmatmul.msk.f32.vlgmr.msra.gmra.mxu3 %vm479_vm0, %v516_v9  ;;  %674 = vst.msk [vmem:[#allocation3 + $0x10] sm:$0xff] %vm671_vm6, %v1658_v33 }
  0x29   : > { %549 = vperm.xlu1 %1491, %v523_v10   ;;  %539 = vperm.xlu2 %1492, %v521_v15   ;;  %675 = vst.msk [vmem:[#allocation3 + $0x18] sm:$0xff] %vm671_vm6, %v1658_v33 }
  0x2a   : > { %500 = vmatpush.msra.mxu0 %v472_v24  ;;  %676 = vst.msk [vmem:[#allocation3 + $0x20] sm:$0xff] %vm671_vm6, %v1658_v33 }
  0x2b   : > { %677 = vst.msk [vmem:[#allocation3 + $0x28] sm:$0xff] %vm671_vm6, %v1658_v33 }
  0x2c   : > { %501 = vmatpush.msra.mxu0 %v471_v25  ;;  %678 = vst.msk [vmem:[#allocation3 + $0x30] sm:$0xff] %vm671_vm6, %v1658_v33 }
  0x2d   : > { %1402 = vmatmul.msk.f32.vlgmr.msra.gmra.mxu0 %vm479_vm0, %v1861_v28  ;;  %679 = vst.msk [vmem:[#allocation3 + $0x38] sm:$0xff] %vm671_vm6, %v1658_v33 }
  0x2e   : > { %534 = vperm.xlu0 %1490, %v520_v12   ;;  %680 = vst.msk [vmem:[#allocation3 + $0x40] sm:$0xff] %vm671_vm6, %v1658_v33 }
  0x2f   : > { %681 = vst.msk [vmem:[#allocation3 + $0x48] sm:$0xff] %vm671_vm6, %v1658_v33 }
  0x30   : > { %1405 = vmatmul.msk.f32.gmra.mxu1 %vm479_vm0, %v512_v13  ;;  %1410 = vmatmul.msk.f32.gmra.mxu3 %vm479_vm0, %v517_v14  ;;  %682 = vst.msk [vmem:[#allocation3 + $0x50] sm:$0xff] %vm671_vm6, %v1658_v33 }
  0x31   : > { %683 = vst.msk [vmem:[#allocation3 + $0x58] sm:$0xff] %vm671_vm6, %v1658_v33 }
  0x32   : > { %684 = vst.msk [vmem:[#allocation3 + $0x60] sm:$0xff] %vm671_vm6, %v1658_v33 }
  0x33   : > { %685 = vst.msk [vmem:[#allocation3 + $0x68] sm:$0xff] %vm671_vm6, %v1658_v33 }
  0x34   : > { %686 = vst.msk [vmem:[#allocation3 + $0x70] sm:$0xff] %vm671_vm6, %v1658_v33 }
  0x35   : > { %1403 = vmatmul.msk.f32.gmra.mxu0 %vm479_vm0, %v1866_v32  ;;  %687 = vst.msk [vmem:[#allocation3 + $0x78] sm:$0xff] %vm671_vm6, %v1658_v33 }
  0x38   : > { %1406 = vmatmul.msk.f32.gmra.mxu1 %vm479_vm0, %v513_v16  ;;  %1411 = vmatmul.msk.f32.gmra.mxu3 %vm479_vm0, %v518_v17 }
  0x40   : > { %1407 = vmatmul.msk.f32.gmra.mxu1 %vm479_vm0, %v514_v18 }
  0x48   : > { %1408 = vmatmul.msk.f32.gmra.mxu1 %vm479_vm0, %v515_v19 }
  0x79   : > { %v545_v23 = vpop.permute.xlu2 %544 }
  0x83   : > { %v540_v34 = vpop.permute.xlu2 %539 }
  0x90   : > { %v565_v26 = vpop.permute.xlu0 %564 }
  0x91   : > { %v555_v27 = vpop.permute.xlu1 %554 }
  0x98   : > { %v560_v35 = vpop.permute.xlu0 %559 }
  0x9b   : > { %v550_v46 = vpop.permute.xlu1 %549 }
  0xa0   : > { %v535_v45 = vpop.permute.xlu0 %534 }
  0xa5   : > { %v1845_v21 = vpop.f32.mrf.mxu1 }
  0xaa   : > { %v503_v2 = vpop.f32.mrf.mxu0 }
  0xab   : > { %v623_v29 = vpop.f32.mrf.mxu3  ;;  %v504_v5 = vadd.f32 %v1493_v0, %v503_v2 }
  0xac   : > { %v624_v30 = vadd.f32 %v623_v29, %v555_v27 }
  0xad   : > { %v611_v31 = vpop.f32.mrf.mxu1  ;;  %v509_v7 = vmul.f32 0.35355338, %v504_v5 }
  0xae   : > { %730 = vrot.lane.b32.xlu0 %v624_v30, %s1657_s16  ;;  %v612_v48 = vadd.f32 %v611_v31, %v535_v45 }
  0xb2   : > { %v506_v8 = vpop.f32.mrf.mxu0 }
  0xb3   : > { %v626_v36 = vpop.f32.mrf.mxu3  ;;  %v507_v10 = vadd.f32 %v1493_v0, %v506_v8 }
  0xb4   : > { %v627_v37 = vadd.f32 %v626_v36, %v560_v35 }
  0xb5   : > { %v614_v38 = vpop.f32.mrf.mxu1  ;;  %v510_v11 = vmul.f32 0.35355338, %v507_v10 }
  0xb6   : > { %v615_v39 = vadd.f32 %v614_v38, %v540_v34  ;;  %739 = vrot.lane.b32.xlu2 %v627_v37, %s1659_s18 }
  0xb8   : > { %703 = vrot.lane.b32.xlu0 %v615_v39, %s1660_s19 }
  0xbb   : > { %v629_v40 = vpop.f32.mrf.mxu3 }
  0xbc   : > { %v630_v41 = vadd.f32 %v629_v40, %v565_v26 }
  0xbd   : > { %v617_v42 = vpop.f32.mrf.mxu1 }
  0xbe   : > { %v618_v44 = vadd.f32 %v617_v42, %v545_v23  ;;  %748 = vrot.lane.b32.xlu1 %v630_v41, %s1661_s26 }
  0xc0   : > { %712 = vrot.lane.b32.xlu2 %v618_v44, %s1662_s28  ;;  %827 = vrot.lane.b32.xlu0 %v1885_v43, %s1663_s29 }
  0xc5   : > { %v620_v47 = vpop.f32.mrf.mxu1 }
  0xc6   : > { %v621_v49 = vadd.f32 %v620_v47, %v550_v46 }
  0xc8   : > { %721 = vrot.lane.b32.xlu1 %v621_v49, %s1664_s17  ;;  %694 = vrot.lane.b32.xlu2 %v612_v48, %s1663_s29 }
  0xc9   : > { %965 = vrot.lane.b32.xlu0 %v1885_v43, %s1664_s17 }
  0xd0   : > { %529 = vperm.xlu1 %1491, %v519_v50   ;;  %919 = vrot.lane.b32.xlu2 %v1885_v43, %s1662_s28 }
  0xd1   : > { %1103 = vrot.lane.b32.xlu0 %v1885_v43, %s1661_s26 }
  0xd8   : > { %873 = vrot.lane.b32.xlu1 %v1885_v43, %s1660_s19  ;;  %1057 = vrot.lane.b32.xlu2 %v1885_v43, %s1659_s18 }
  0xd9   : > { %921 = vrot.lane.b32.xlu0 %v1902_v51, %s1662_s28 }
  0xe0   : > { %1011 = vrot.lane.b32.xlu1 %v1885_v43, %s1657_s16  ;;  %875 = vrot.lane.b32.xlu2 %v1902_v51, %s1660_s19 }
  0xe1   : > { %1059 = vrot.lane.b32.xlu0 %v1902_v51, %s1659_s18 }
  0xe8   : > { %829 = vrot.lane.b32.xlu1 %v1902_v51, %s1663_s29  ;;  %1013 = vrot.lane.b32.xlu2 %v1902_v51, %s1657_s16 }
  0xf0   : > { %967 = vrot.lane.b32.xlu1 %v1902_v51, %s1664_s17 }
  0xf8   : > { %1105 = vrot.lane.b32.xlu1 %v1902_v51, %s1661_s26 }
 0x110   : > { %v740_v52 = vpop.permute.xlu2 %739 }
 0x111   : > { %743 = vst.msk [vmem:[#allocation2 + $0x30] sm:$0xff] %vm742_vm1, %v740_v52 }
 0x118   : > { %v762_v60 = vld [vmem:[#allocation2 + $0x30] sm:$0xff] }
 0x11a   : > { %v713_v53 = vpop.permute.xlu2 %712 }
 0x11b   : > { %716 = vst.msk [vmem:[#allocation2 + $0x18] sm:$0xff] %vm715_vm2, %v713_v53 }
 0x120   : > { %v731_v54 = vpop.permute.xlu0 %730 }
 0x121   : > { %734 = vst.msk [vmem:[#allocation2 + $0x28] sm:$0xff] %vm733_vm3, %v731_v54 }
 0x122   : > { %v695_v55 = vpop.permute.xlu2 %694  ;;  %v759_v3 = vld [vmem:[#allocation2 + $0x18] sm:$0xff] }
 0x123   : > { %698 = vst.msk [vmem:[#allocation2 + $0x8] sm:$0xff] %vm697_vm4, %v695_v55 }
 0x128   : > { %v761_v61 = vld [vmem:[#allocation2 + $0x28] sm:$0xff] }
 0x12a   : > { %v704_v56 = vpop.permute.xlu0 %703  ;;  %v757_v6 = vld [vmem:[#allocation2 + $0x8] sm:$0xff]  ;;  %v920_v14 = vpop.permute.xlu2 %919 }
 0x12b   : > { %707 = vst.msk [vmem:[#allocation2 + $0x10] sm:$0xff] %vm706_vm5, %v704_v56 }
 0x130   : > { %v749_v57 = vpop.permute.xlu1 %748 }
 0x131   : > { %752 = vst.msk [vmem:[#allocation2 + $0x38] sm:$0xff] %vm751_vm7, %v749_v57 }
 0x132   : > { %v758_v4 = vld [vmem:[#allocation2 + $0x10] sm:$0xff]  ;;  %v828_v12 = vpop.permute.xlu0 %827  ;;  %v1058_v24 = vpop.permute.xlu2 %1057 }
 0x138   : > { %v763_v58 = vld [vmem:[#allocation2 + $0x38] sm:$0xff] }
 0x139   : > { %778 = vmatpush.msrb.mxu3 %v763_v58 }
 0x13a   : > { %v722_v59 = vpop.permute.xlu1 %721  ;;  %v876_v41 = vpop.permute.xlu2 %875 }
 0x13b   : > { %725 = vst.msk [vmem:[#allocation2 + $0x20] sm:$0xff] %vm724_vm8, %v722_v59  ;;  %779 = vmatpush.msrb.mxu3 %v762_v60  ;;  %v966_v13 = vpop.permute.xlu0 %965 }
 0x13d   : > { %780 = vmatpush.msrb.mxu3 %v761_v61 }
 0x142   : > { %v530_v62 = vpop.permute.xlu1 %529  ;;  %v760_v63 = vld [vmem:[#allocation2 + $0x20] sm:$0xff]  ;;  %v1014_v53 = vpop.permute.xlu2 %1013 }
 0x143   : > { %v609_v1 = vadd.f32 %v1845_v21, %v530_v62  ;;  %781 = vmatpush.msrb.mxu3 %v760_v63  ;;  %v1104_v17 = vpop.permute.xlu0 %1103 }
 0x145   : > { %689 = vst.msk [vmem:[#allocation2] sm:$0xff] %vm688_vm9, %v609_v1  ;;  %782 = vmatpush.msrb.mxu3 %v759_v3 }
 0x147   : > { %783 = vmatpush.msrb.mxu3 %v758_v4 }
 0x149   : > { %784 = vmatpush.msrb.mxu3 %v757_v6 }
 0x14a   : > { %v874_v15 = vpop.permute.xlu1 %873 }
 0x14b   : > { %v922_v30 = vpop.permute.xlu0 %921 }
 0x14c   : > { %v756_v9 = vld [vmem:[#allocation2] sm:$0xff] }
 0x14d   : > { %785 = vmatpush.msrb.mxu3 %v756_v9 }
 0x14e   : > { %1414 = vmatmul.msk.f32.vlgmr.msrb.gmra.mxu3 %vm671_vm6, %v509_v7 }
 0x152   : > { %v1012_v25 = vpop.permute.xlu1 %1011 }
 0x153   : > { %v1060_v42 = vpop.permute.xlu0 %1059 }
 0x156   : > { %1415 = vmatmul.msk.f32.gmra.mxu3 %vm671_vm6, %v510_v11 }
 0x15a   : > { %v830_v37 = vpop.permute.xlu1 %829 }
 0x162   : > { %v968_v49 = vpop.permute.xlu1 %967 }
 0x16a   : > { %v1106_v60 = vpop.permute.xlu1 %1105 }
 0x1d1   : > { %v787_v16 = vpop.f32.mrf.mxu3 }
 0x1d2   : > { %v1970_v18 = vadd.f32 %v920_v14, %v787_v16  ;;  %v1972_v19 = vadd.f32 %v874_v15, %v787_v16  ;;  %v1974_v20 = vadd.f32 %v828_v12, %v787_v16  ;;  %v1982_v26 = vadd.f32 %v1104_v17, %v787_v16 }
 0x1d3   : > { %v1984_v27 = vadd.f32 %v1058_v24, %v787_v16  ;;  %v1986_v29 = vadd.f32 %v966_v13, %v787_v16  ;;  %v1996_v38 = vadd.f32 %v1012_v25, %v787_v16  ;;  %v1999_v39 = vadd.f32 %v787_v16, %v1885_v43 }
 0x1d4   : > { %v927_v21 = vsel %vm715_vm2, %v1970_v18, -inf  ;;  %v881_v22 = vsel %vm706_vm5, %v1972_v19, -inf  ;;  %v835_v23 = vsel %vm697_vm4, %v1974_v20, -inf  ;;  %v1111_v33 = vsel %vm751_vm7, %v1982_v26, -inf }
 0x1d5   : > { %928 = vmax.xlane.f32.xlu1 %v927_v21  ;;  %882 = vmax.xlane.f32.xlu0 %v881_v22  ;;  %v1065_v34 = vsel %vm742_vm1, %v1984_v27, -inf  ;;  %v973_v35 = vsel %vm724_vm8, %v1986_v29, -inf  ;;  %v1019_v44 = vsel %vm733_vm3, %v1996_v38, -inf  ;;  %v795_v45 = vsel %vm688_vm9, %v1999_v39, -inf }
 0x1d6   : > { %836 = vmax.xlane.f32.xlu2 %v835_v23 }
 0x1d9   : > { %v790_v31 = vpop.f32.mrf.mxu3 }
 0x1da   : > { %v1994_v36 = vadd.f32 %v922_v30, %v790_v31  ;;  %v2007_v46 = vadd.f32 %v1060_v42, %v790_v31  ;;  %v2009_v47 = vadd.f32 %v876_v41, %v790_v31  ;;  %v2011_v43 = vadd.f32 %v830_v37, %v790_v31 }
 0x1db   : > { %v2020_v54 = vadd.f32 %v790_v31, %v1902_v51  ;;  %v2022_v55 = vadd.f32 %v1014_v53, %v790_v31  ;;  %v2024_v56 = vadd.f32 %v968_v49, %v790_v31  ;;  %v2032_v61 = vadd.f32 %v1106_v60, %v790_v31 }
 0x1dc   : > { %v930_v40 = vsel %vm715_vm2, %v1994_v36, -inf  ;;  %v1068_v48 = vsel %vm742_vm1, %v2007_v46, -inf  ;;  %v884_v50 = vsel %vm706_vm5, %v2009_v47, -inf  ;;  %v838_v52 = vsel %vm697_vm4, %v2011_v43, -inf }
 0x1dd   : > { %1112 = vmax.xlane.f32.xlu1 %v1111_v33  ;;  %1066 = vmax.xlane.f32.xlu0 %v1065_v34  ;;  %v798_v57 = vsel %vm688_vm9, %v2020_v54, -inf  ;;  %v1022_v58 = vsel %vm733_vm3, %v2022_v55, -inf  ;;  %v976_v59 = vsel %vm724_vm8, %v2024_v56, -inf  ;;  %v1114_v51 = vsel %vm751_vm7, %v2032_v61, -inf }
 0x1de   : > { %974 = vmax.xlane.f32.xlu2 %v973_v35 }
 0x1e5   : > { %931 = vmax.xlane.f32.xlu1 %v930_v40  ;;  %796 = vmax.xlane.f32.xlu0 %v795_v45 }
 0x1e6   : > { %1020 = vmax.xlane.f32.xlu2 %v1019_v44 }
 0x1ed   : > { %1069 = vmax.xlane.f32.xlu1 %v1068_v48  ;;  %885 = vmax.xlane.f32.xlu0 %v884_v50 }
 0x1ee   : > { %839 = vmax.xlane.f32.xlu2 %v838_v52 }
 0x1f5   : > { %799 = vmax.xlane.f32.xlu1 %v798_v57  ;;  %1023 = vmax.xlane.f32.xlu0 %v1022_v58  ;;  %v634_v58 = vld [vmem:[%s2310_s7 + $0x10] sm:$0xff] }
 0x1f6   : > { %977 = vmax.xlane.f32.xlu2 %v976_v59  ;;  %v633_v59 = vld [vmem:[%s2310_s7 + $0x8] sm:$0xff] }
 0x1fe   : > { %1115 = vmax.xlane.f32.xlu2 %v1114_v51 }
 0x248   : > { %v929_v62 = vpop.xlane.xlu1 %928  ;;  %v883_v0 = vpop.xlane.xlu0 %882 }
 0x249   : > { %v933_v63 = vsub.f32 %v1970_v18, %v929_v62  ;;  %v837_v1 = vpop.xlane.xlu2 %836  ;;  %v887_v2 = vsub.f32 %v1972_v19, %v883_v0 }
 0x24a   : > { %v841_v3 = vsub.f32 %v1974_v20, %v837_v1 }
 0x24b   : > { %v935_v4 = vmul.f32 1.442695, %v933_v63  ;;  %v889_v5 = vmul.f32 1.442695, %v887_v2 }
 0x24c   : > { %v843_v6 = vmul.f32 1.442695, %v841_v3 }
 0x24d   : > { %1496 = vpow2.f32 %v935_v4 }
 0x24e   : > { %1498 = vpow2.f32 %v889_v5 }
 0x24f   : > { %1500 = vpow2.f32 %v843_v6 }
 0x250   : > { %v1113_v7 = vpop.xlane.xlu1 %1112  ;;  %v1067_v8 = vpop.xlane.xlu0 %1066 }
 0x251   : > { %v975_v9 = vpop.xlane.xlu2 %974  ;;  %v1071_v10 = vsub.f32 %v1984_v27, %v1067_v8  ;;  %v1117_v17 = vsub.f32 %v1982_v26, %v1113_v7 }
 0x252   : > { %v979_v11 = vsub.f32 %v1986_v29, %v975_v9 }
 0x253   : > { %v2041_v12 = vpop.eup %1496  ;;  %v1073_v14 = vmul.f32 1.442695, %v1071_v10  ;;  %v1119_v21 = vmul.f32 1.442695, %v1117_v17 }
 0x254   : > { %v2043_v13 = vpop.eup %1498  ;;  %v981_v15 = vmul.f32 1.442695, %v979_v11  ;;  %941 = vrot.lane.b32.xlu1 %v2041_v12, %s1657_s16 }
 0x255   : > { %v2047_v16 = vpop.eup %1500  ;;  %895 = vrot.lane.b32.xlu0 %v2043_v13, %s1659_s18  ;;  %1502 = vpow2.f32 %v1073_v14 }
 0x256   : > { %849 = vrot.lane.b32.xlu2 %v2047_v16, %s1661_s26  ;;  %1504 = vpow2.f32 %v981_v15 }
 0x258   : > { %v932_v19 = vpop.xlane.xlu1 %931  ;;  %v797_v45 = vpop.xlane.xlu0 %796 }
 0x259   : > { %v1021_v18 = vpop.xlane.xlu2 %1020  ;;  %v934_v25 = vsub.f32 %v1994_v36, %v932_v19  ;;  %v801_v50 = vsub.f32 %v1999_v39, %v797_v45  ;;  %v635_v39 = vld [vmem:[%s2310_s7 + $0x18] sm:$0xff] }
 0x25a   : > { %v1025_v20 = vsub.f32 %v1996_v38, %v1021_v18  ;;  %652 = vmatpush.msra.mxu2 %v635_v39 }
 0x25b   : > { %v2055_v22 = vpop.eup %1502  ;;  %v937_v27 = vmul.f32 1.442695, %v934_v25  ;;  %v803_v52 = vmul.f32 1.442695, %v801_v50 }
 0x25c   : > { %v1027_v23 = vmul.f32 1.442695, %v1025_v20  ;;  %v2057_v24 = vpop.eup %1504  ;;  %1079 = vrot.lane.b32.xlu1 %v2055_v22, %s1660_s19  ;;  %653 = vmatpush.msra.mxu2 %v634_v58  ;;  %v1494_v58 = vld [vmem:[%s2311_s8] ss:$0 sm:$0xff] }
 0x25d   : > { %987 = vrot.lane.b32.xlu0 %v2057_v24, %s1664_s17 }
 0x25e   : > { %1506 = vpow2.f32 %v1027_v23  ;;  %654 = vmatpush.msra.mxu2 %v633_v59 }
 0x25f   : > { %1508 = vpow2.f32 %v1119_v21 }
 0x260   : > { %v1070_v30 = vpop.xlane.xlu1 %1069  ;;  %1510 = vpow2.f32 %v937_v27  ;;  %v886_v60 = vpop.xlane.xlu0 %885 }
 0x261   : > { %v840_v26 = vpop.xlane.xlu2 %839  ;;  %v1072_v35 = vsub.f32 %v2007_v46, %v1070_v30  ;;  %v888_v51 = vsub.f32 %v2009_v47, %v886_v60 }
 0x262   : > { %v842_v29 = vsub.f32 %v2011_v43, %v840_v26 }
 0x263   : > { %v1075_v37 = vmul.f32 1.442695, %v1072_v35  ;;  %v891_v63 = vmul.f32 1.442695, %v888_v51 }
 0x264   : > { %v2065_v31 = vpop.eup %1506  ;;  %v845_v33 = vmul.f32 1.442695, %v842_v29 }
 0x265   : > { %v2067_v34 = vpop.eup %1508  ;;  %1033 = vrot.lane.b32.xlu2 %v2065_v31, %s1662_s28 }
 0x266   : > { %1125 = vrot.lane.b32.xlu0 %v2067_v34, %s1663_s29  ;;  %1512 = vpow2.f32 %v845_v33  ;;  %v2075_v40 = vpop.eup %1510 }
 0x267   : > { %1514 = vpow2.f32 %v1075_v37 }
 0x268   : > { %v800_v62 = vpop.xlane.xlu1 %799  ;;  %v1024_v1 = vpop.xlane.xlu0 %1023 }
 0x269   : > { %v978_v36 = vpop.xlane.xlu2 %977  ;;  %v802_v0 = vsub.f32 %v2020_v54, %v800_v62  ;;  %v1026_v2 = vsub.f32 %v2022_v55, %v1024_v1 }
 0x26a   : > { %v980_v38 = vsub.f32 %v2024_v56, %v978_v36 }
 0x26b   : > { %v805_v3 = vmul.f32 1.442695, %v802_v0  ;;  %v1029_v4 = vmul.f32 1.442695, %v1026_v2 }
 0x26c   : > { %v983_v41 = vmul.f32 1.442695, %v980_v38  ;;  %v2077_v42 = vpop.eup %1512 }
 0x26d   : > { %851 = vrot.lane.b32.xlu2 %v2077_v42, %s1661_s26  ;;  %v2084_v43 = vpop.eup %1514 }
 0x26e   : > { %943 = vrot.lane.b32.xlu0 %v2075_v40, %s1657_s16  ;;  %1516 = vpow2.f32 %v983_v41 }
 0x271   : > { %v1116_v44 = vpop.xlane.xlu2 %1115 }
 0x272   : > { %v1118_v46 = vsub.f32 %v2032_v61, %v1116_v44  ;;  %v632_v61 = vld [vmem:[%s2310_s7] sm:$0xff] }
 0x273   : > { %655 = vmatpush.msra.mxu2 %v632_v61 }
 0x274   : > { %v1121_v48 = vmul.f32 1.442695, %v1118_v46  ;;  %v2086_v49 = vpop.eup %1516  ;;  %1412 = vmatmul.msk.f32.vlgmr.msra.gmra.mxu2 %vm479_vm0, %v1861_v28 }
 0x275   : > { %989 = vrot.lane.b32.xlu2 %v2086_v49, %s1664_s17 }
 0x276   : > { %1518 = vpow2.f32 %v1121_v48  ;;  %1081 = vrot.lane.b32.xlu0 %v2084_v43, %s1660_s19  ;;  %s1429_s19 = sshll.u32 %s1753_s25, 4  ;;  %s1580_s25 = scalar_lea.hbm %s2315_s12, 32 }
 0x277   : > { %1520 = vpow2.f32 %v803_v52  ;;  %s1267_s1 = scalar_lea.hbm %s2315_s12, %s1429_s19 }
 0x278   : > { %1522 = vpow2.f32 %v891_v63  ;;  %s1270_s30 = sshll.u32 %s1267_s1, 4  ;;  %s1271_s30 = int_to_ptr.hbm [resolvable:$true] %s1270_s30 }
 0x279   : > { %1524 = vpow2.f32 %v805_v3  ;;  %s1574_s16 = sshra.s32 %s1271_s30, 4  ;;  %s1575_s16 = int_to_ptr.hbm [resolvable:$true] %s1574_s16 }
 0x27a   : > { %1526 = vpow2.f32 %v1029_v4  ;;  %s1576_s26 = scalar_lea.hbm %s1575_s16, 16  ;;  %p1581_p0 = scmp.lt.s32.totalorder %s1575_s16, %s2315_s12 }
 0x27b   : > { %p1577_p11 = scmp.ne.s32.totalorder %s1575_s16, %s1576_s26  ;;  %p1582_p1 = scmp.lt.s32.totalorder %s1580_s25, %s1576_s26 }
 0x27c   : > { %v2093_v53 = vpop.eup %1518  ;;  %1413 = vmatmul.msk.f32.gmra.mxu2 %vm479_vm0, %v1866_v32 }
 0x27d   : > { %1127 = vrot.lane.b32.xlu2 %v2093_v53, %s1663_s29  ;;  %v2097_v56 = vpop.eup %1520  ;;  %p1578_p12 = pnand %p1577_p11, %p1770_p5  ;;  %p1583_p2 = por %p1582_p1, %p1581_p0 }
 0x27e   : > { %v807_v57 = vsel %vm688_vm9, %v2097_v56, 0.0  ;;  %v2120_v5 = vpop.eup %1522 }
 0x27f   : > { %v2124_v28 = vpop.eup %1524  ;;  %p1579_p13 = pneg %p1578_p12 }
 0x280   : > { %v810_v47 = vsel %vm688_vm9, %v2124_v28, 0.0  ;;  %v2128_v54 = vpop.eup %1526 }
 0x281   : > { %p1584_p3 = pnand %p1583_p2, %p1579_p13 }
 0x286   : > { %808 = vadd.xlane.f32.xlu1 %v807_v57 }
 0x29f   : > { %897 = vrot.lane.b32.xlu1 %v2120_v5, %s1659_s18  ;;  %s2145_s18 = sand.u32 1, %s1646_s22  }
 0x2a6   : > { %811 = vadd.xlane.f32.xlu2 %v810_v47 }
 0x2a7   : > { %1035 = vrot.lane.b32.xlu1 %v2128_v54, %s1662_s28  ;;  %s2316_s28 = sshll.u32 %s2145_s18, 4 }
 0x2a8   : > { %s2151_s20 = scalar_lea.vmem [#allocation6], %s2316_s28  ;;  %s1239_s28 = scalar_lea.sflag [#allocation7], %s2145_s18 }
 0x2a9   : > { %s1268_s29 = sshll.u32 %s2151_s20, 4  ;;  %s1269_s29 = int_to_ptr.vmem [resolvable:$true] %s1268_s29 }
 0x2b0   : > { %v850_v32 = vpop.permute.xlu2 %849 }
 0x2b1   : > { %v855_v55 = vsel %vm688_vm9, %v850_v32, 0.0 }
 0x2b2   : > { %856 = vadd.xlane.f32.xlu0 %v855_v55 }
 0x2bf   : > { %v1034_v9 = vpop.permute.xlu2 %1033 }
 0x2c0   : > { %v1039_v11 = vsel %vm688_vm9, %v1034_v9, 0.0 }
 0x2c6   : > { %v942_v8 = vpop.permute.xlu1 %941 }
 0x2c7   : > { %v896_v6 = vpop.permute.xlu0 %895  ;;  %v947_v15 = vsel %vm688_vm9, %v942_v8, 0.0  ;;  %v852_v21 = vpop.permute.xlu2 %851 }
 0x2c8   : > { %v901_v7 = vsel %vm688_vm9, %v896_v6, 0.0  ;;  %v858_v26 = vsel %vm688_vm9, %v852_v21, 0.0 }
 0x2c9   : > { %902 = vadd.xlane.f32.xlu2 %v901_v7 }
 0x2ce   : > { %v1080_v17 = vpop.permute.xlu1 %1079 }
 0x2cf   : > { %v988_v10 = vpop.permute.xlu0 %987  ;;  %v1085_v20 = vsel %vm688_vm9, %v1080_v17, 0.0  ;;  %v990_v27 = vpop.permute.xlu2 %989 }
 0x2d0   : > { %v993_v14 = vsel %vm688_vm9, %v988_v10, 0.0  ;;  %v996_v33 = vsel %vm688_vm9, %v990_v27, 0.0 }
 0x2d1   : > { %1040 = vadd.xlane.f32.xlu2 %v1039_v11  ;;  %994 = vadd.xlane.f32.xlu0 %v993_v14 }
 0x2d2   : > { %948 = vadd.xlane.f32.xlu1 %v947_v15 }
 0x2d7   : > { %v1128_v35 = vpop.permute.xlu2 %1127 }
 0x2d8   : > { %v1126_v18 = vpop.permute.xlu0 %1125  ;;  %v1134_v36 = vsel %vm688_vm9, %v1128_v35, 0.0 }
 0x2d9   : > { %v1131_v19 = vsel %vm688_vm9, %v1126_v18, 0.0 }
 0x2da   : > { %1132 = vadd.xlane.f32.xlu0 %v1131_v19  ;;  %1086 = vadd.xlane.f32.xlu1 %v1085_v20 }
 0x2e0   : > { %v944_v23 = vpop.permute.xlu0 %943 }
 0x2e1   : > { %v950_v25 = vsel %vm688_vm9, %v944_v23, 0.0 }
 0x2e2   : > { %951 = vadd.xlane.f32.xlu2 %v950_v25  ;;  %859 = vadd.xlane.f32.xlu1 %v858_v26 }
 0x2e8   : > { %v1082_v29 = vpop.permute.xlu0 %1081 }
 0x2e9   : > { %v1088_v30 = vsel %vm688_vm9, %v1082_v29, 0.0 }
 0x2ea   : > { %1089 = vadd.xlane.f32.xlu2 %v1088_v30  ;;  %997 = vadd.xlane.f32.xlu1 %v996_v33 }
 0x2f2   : > { %1135 = vadd.xlane.f32.xlu1 %v1134_v36 }
 0x2f7   : > { %v657_v52 = vpop.f32.mrf.mxu2 }
 0x2f8   : > { %v2160_v59 = vadd.f32 %v1494_v58, %v657_v52 }
 0x2f9   : > { %v809_v37 = vpop.xlane.xlu1 %808 }
 0x2fa   : > { %1528 = vrcp.f32 %v809_v37  ;;  %754 = vst.msk [vmem:[#allocation3 + $0x70] sm:$0xff] %vm753_vm10, %v2160_v59 }
 0x2fb   : > { %745 = vst.msk [vmem:[#allocation3 + $0x60] sm:$0xff] %vm744_vm11, %v2160_v59 }
 0x2fc   : > { %736 = vst.msk [vmem:[#allocation3 + $0x50] sm:$0xff] %vm735_vm12, %v2160_v59 }
 0x2fd   : > { %727 = vst.msk [vmem:[#allocation3 + $0x40] sm:$0xff] %vm726_vm13, %v2160_v59 }
 0x2fe   : > { %718 = vst.msk [vmem:[#allocation3 + $0x30] sm:$0xff] %vm717_vm14, %v2160_v59 }
 0x2ff   : > { %v660_v60 = vpop.f32.mrf.mxu2  ;;  %709 = vst.msk [vmem:[#allocation3 + $0x20] sm:$0xff] %vm708_vm15, %v2160_v59 }
 0x300   : > { %v1529_v38 = vpop.eup %1528  ;;  %v661_v61 = vadd.f32 %v1494_v58, %v660_v60 }
 0x301   : > { %v815_v41 = vmul.f32 %v1529_v38, %v809_v37  ;;  %v1165_v4 = vld [vmem:[#allocation3 + $0x70] sm:$0xff] }
 0x302   : > { %755 = vst.msk [vmem:[#allocation3 + $0x78] sm:$0xff] %vm753_vm10, %v661_v61  ;;  %v1163_v6 = vld [vmem:[#allocation3 + $0x60] sm:$0xff]  ;;  %vm690_vm10 = vcmask 64512  }
 0x303   : > { %v817_v44 = vsub.f32 2.0, %v815_v41  ;;  %746 = vst.msk [vmem:[#allocation3 + $0x68] sm:$0xff] %vm744_vm11, %v661_v61  ;;  %v1161_v9 = vld [vmem:[#allocation3 + $0x50] sm:$0xff] }
 0x304   : > { %737 = vst.msk [vmem:[#allocation3 + $0x58] sm:$0xff] %vm735_vm12, %v661_v61  ;;  %v1159_v14 = vld [vmem:[#allocation3 + $0x40] sm:$0xff] }
 0x305   : > { %v819_v45 = vmul.f32 %v1529_v38, %v817_v44  ;;  %728 = vst.msk [vmem:[#allocation3 + $0x48] sm:$0xff] %vm726_vm13, %v661_v61  ;;  %v1157_v17 = vld [vmem:[#allocation3 + $0x30] sm:$0xff] }
 0x306   : > { %719 = vst.msk [vmem:[#allocation3 + $0x38] sm:$0xff] %vm717_vm14, %v661_v61  ;;  %v1155_v19 = vld [vmem:[#allocation3 + $0x20] sm:$0xff] }
 0x307   : > { %v821_v46 = vmul.f32 %v2097_v56, %v819_v45  ;;  %710 = vst.msk [vmem:[#allocation3 + $0x28] sm:$0xff] %vm708_vm15, %v661_v61 }
 0x308   : > { %692 = vst.msk [vmem:[#allocation3 + $0x8] sm:$0xff] %vm690_vm10, %v661_v61 }
 0x309   : > { %823 = vst.msk [vmem:[%s2151_s20] sm:$0xff] %vm688_vm9, %v821_v46  ;;  %v1166_v2 = vld [vmem:[#allocation3 + $0x78] sm:$0xff] }
 0x30a   : > { %1167 = vmatpush.msrb.mxu0 %v1166_v2  ;;  %v1164_v47 = vld [vmem:[#allocation3 + $0x68] sm:$0xff]  ;;  %691 = vst.msk [vmem:[#allocation3] sm:$0xff] %vm690_vm10, %v2160_v59 }
 0x30b   : > { %v1162_v7 = vld [vmem:[#allocation3 + $0x58] sm:$0xff] }
 0x30c   : > { %1168 = vmatpush.msrb.mxu0 %v1165_v4  ;;  %v1160_v11 = vld [vmem:[#allocation3 + $0x48] sm:$0xff] }
 0x30d   : > { %v1158_v15 = vld [vmem:[#allocation3 + $0x38] sm:$0xff] }
 0x30e   : > { %1169 = vmatpush.msrb.mxu0 %v1164_v47  ;;  %v1156_v18 = vld [vmem:[#allocation3 + $0x28] sm:$0xff] }
 0x30f   : > { %v1152_v25 = vld [vmem:[#allocation3 + $0x8] sm:$0xff] }
 0x310   : > { %1170 = vmatpush.msrb.mxu0 %v1163_v6 }
 0x311   : > { %v898_v48 = vpop.permute.xlu1 %897  ;;  %v1151_v33 = vld [vmem:[#allocation3] sm:$0xff] }
 0x312   : > { %v904_v50 = vsel %vm688_vm9, %v898_v48, 0.0  ;;  %1171 = vmatpush.msrb.mxu0 %v1162_v7 }
 0x313   : > { %905 = vadd.xlane.f32.xlu0 %v904_v50 }
 0x314   : > { %1172 = vmatpush.msrb.mxu0 %v1161_v9 }
 0x316   : > { %1173 = vmatpush.msrb.mxu0 %v1160_v11 }
 0x318   : > { %1174 = vmatpush.msrb.mxu0 %v1159_v14 }
 0x319   : > { %v812_v57 = vpop.xlane.xlu2 %811  ;;  %v1036_v39 = vpop.permute.xlu1 %1035 }
 0x31a   : > { %1530 = vrcp.f32 %v812_v57  ;;  %v1042_v56 = vsel %vm688_vm9, %v1036_v39, 0.0  ;;  %1175 = vmatpush.msrb.mxu0 %v1158_v15 }
 0x31b   : > { %1043 = vadd.xlane.f32.xlu0 %v1042_v56 }
 0x31c   : > { %1176 = vmatpush.msrb.mxu0 %v1157_v17  ;;  %v1197_v17 = vld [vmem:[%s2312_s9 + $0x38] sm:$0xff] }
 0x31d   : > { %1216 = vmatpush.msrb.mxu2 %v1197_v17 }
 0x31e   : > { %1177 = vmatpush.msrb.mxu0 %v1156_v18 }
 0x320   : > { %v1531_v51 = vpop.eup %1530  ;;  %1178 = vmatpush.msrb.mxu0 %v1155_v19  ;;  %v1195_v19 = vld [vmem:[%s2312_s9 + $0x28] sm:$0xff] }
 0x321   : > { %v816_v62 = vmul.f32 %v1531_v51, %v812_v57 }
 0x323   : > { %v818_v63 = vsub.f32 2.0, %v816_v62 }
 0x325   : > { %v857_v0 = vpop.xlane.xlu0 %856  ;;  %v820_v1 = vmul.f32 %v1531_v51, %v818_v63 }
 0x326   : > { %1532 = vrcp.f32 %v857_v0 }
 0x327   : > { %v822_v3 = vmul.f32 %v2124_v28, %v820_v1 }
 0x329   : > { %824 = vst.msk [vmem:[%s2151_s20 + $0x8] sm:$0xff] %vm688_vm9, %v822_v3  ;;  %vm699_vm9 = vcmask 130112  }
 0x32a   : > { %701 = vst.msk [vmem:[#allocation3 + $0x18] sm:$0xff] %vm699_vm9, %v661_v61 }
 0x32b   : > { %700 = vst.msk [vmem:[#allocation3 + $0x10] sm:$0xff] %vm699_vm9, %v2160_v59 }
 0x32c   : > { %v1533_v32 = vpop.eup %1532 }
 0x32d   : > { %v863_v55 = vmul.f32 %v1533_v32, %v857_v0 }
 0x32f   : > { %v865_v28 = vsub.f32 2.0, %v863_v55 }
 0x331   : > { %v867_v8 = vmul.f32 %v1533_v32, %v865_v28  ;;  %v1154_v20 = vld [vmem:[#allocation3 + $0x18] sm:$0xff] }
 0x332   : > { %1179 = vmatpush.msrb.mxu0 %v1154_v20  ;;  %v1153_v21 = vld [vmem:[#allocation3 + $0x10] sm:$0xff]  ;;  %v1194_v20 = vld [vmem:[%s2312_s9 + $0x20] sm:$0xff] }
 0x333   : > { %v869_v10 = vmul.f32 %v2047_v16, %v867_v8 }
 0x334   : > { %1180 = vmatpush.msrb.mxu0 %v1153_v21 }
 0x335   : > { %871 = vst.msk [vmem:[%s2151_s20] sm:$0xff] %vm697_vm4, %v869_v10 }
 0x336   : > { %1181 = vmatpush.msrb.mxu0 %v1152_v25 }
 0x338   : > { %1182 = vmatpush.msrb.mxu0 %v1151_v33 }
 0x33c   : > { %v903_v16 = vpop.xlane.xlu2 %902 }
 0x33d   : > { %1534 = vrcp.f32 %v903_v16 }
 0x343   : > { %v1535_v23 = vpop.eup %1534 }
 0x344   : > { %v909_v26 = vmul.f32 %v1535_v23, %v903_v16  ;;  %v1041_v27 = vpop.xlane.xlu2 %1040  ;;  %v995_v29 = vpop.xlane.xlu0 %994 }
 0x345   : > { %1536 = vrcp.f32 %v1041_v27  ;;  %v949_v30 = vpop.xlane.xlu1 %948 }
 0x346   : > { %v911_v35 = vsub.f32 2.0, %v909_v26  ;;  %1538 = vrcp.f32 %v995_v29 }
 0x347   : > { %1540 = vrcp.f32 %v949_v30 }
 0x348   : > { %v913_v36 = vmul.f32 %v1535_v23, %v911_v35 }
 0x34a   : > { %v915_v37 = vmul.f32 %v2043_v13, %v913_v36  ;;  %v1192_v36 = vld [vmem:[%s2312_s9 + $0x10] sm:$0xff] }
 0x34b   : > { %v1537_v38 = vpop.eup %1536 }
 0x34c   : > { %v1539_v41 = vpop.eup %1538  ;;  %917 = vst.msk [vmem:[%s2151_s20] sm:$0xff] %vm706_vm5, %v915_v37  ;;  %v1047_v44 = vmul.f32 %v1537_v38, %v1041_v27 }
 0x34d   : > { %v1541_v45 = vpop.eup %1540  ;;  %v1001_v46 = vmul.f32 %v1539_v41, %v995_v29  ;;  %v1133_v48 = vpop.xlane.xlu0 %1132 }
 0x34e   : > { %v1087_v50 = vpop.xlane.xlu1 %1086  ;;  %v1049_v52 = vsub.f32 2.0, %v1047_v44  ;;  %v955_v57 = vmul.f32 %v1541_v45, %v949_v30  ;;  %1542 = vrcp.f32 %v1133_v48  ;;  %v1193_v30 = vld [vmem:[%s2312_s9 + $0x18] sm:$0xff] }
 0x34f   : > { %v1003_v39 = vsub.f32 2.0, %v1001_v46  ;;  %1544 = vrcp.f32 %v1087_v50  ;;  %v1191_v46 = vld [vmem:[%s2312_s9 + $0x8] sm:$0xff] }
 0x350   : > { %v957_v58 = vsub.f32 2.0, %v955_v57  ;;  %v1051_v13 = vmul.f32 %v1537_v38, %v1049_v52 }
 0x351   : > { %v1005_v56 = vmul.f32 %v1539_v41, %v1003_v39 }
 0x352   : > { %v959_v59 = vmul.f32 %v1541_v45, %v957_v58  ;;  %v1053_v1 = vmul.f32 %v2065_v31, %v1051_v13 }
 0x353   : > { %v1007_v62 = vmul.f32 %v2057_v24, %v1005_v56 }
 0x354   : > { %v1543_v60 = vpop.eup %1542  ;;  %v961_v61 = vmul.f32 %v2041_v12, %v959_v59 }
 0x355   : > { %v1545_v51 = vpop.eup %1544  ;;  %v1139_v63 = vmul.f32 %v1543_v60, %v1133_v48  ;;  %v952_v9 = vpop.xlane.xlu2 %951 }
 0x356   : > { %v860_v0 = vpop.xlane.xlu1 %859  ;;  %963 = vst.msk [vmem:[%s2151_s20] sm:$0xff] %vm715_vm2, %v961_v61  ;;  %v1093_v2 = vmul.f32 %v1545_v51, %v1087_v50 }
 0x357   : > { %1009 = vst.msk [vmem:[%s2151_s20] sm:$0xff] %vm724_vm8, %v1007_v62  ;;  %v1141_v3 = vsub.f32 2.0, %v1139_v63  ;;  %1546 = vrcp.f32 %v860_v0  ;;  %v1190_v62 = vld [vmem:[%s2312_s9] sm:$0xff] }
 0x358   : > { %1055 = vst.msk [vmem:[%s2151_s20] sm:$0xff] %vm733_vm3, %v1053_v1  ;;  %v1095_v12 = vsub.f32 2.0, %v1093_v2  ;;  %1548 = vrcp.f32 %v952_v9 }
 0x359   : > { %v1143_v4 = vmul.f32 %v1543_v60, %v1141_v3 }
 0x35a   : > { %v1097_v24 = vmul.f32 %v1545_v51, %v1095_v12 }
 0x35b   : > { %v1145_v55 = vmul.f32 %v2067_v34, %v1143_v4 }
 0x35c   : > { %v1099_v47 = vmul.f32 %v2055_v22, %v1097_v24 }
 0x35d   : > { %v1547_v32 = vpop.eup %1546  ;;  %v1090_v22 = vpop.xlane.xlu2 %1089 }
 0x35e   : > { %1101 = vst.msk [vmem:[%s2151_s20] sm:$0xff] %vm742_vm1, %v1099_v47  ;;  %v864_v31 = vmul.f32 %v1547_v32, %v860_v0  ;;  %v998_v10 = vpop.xlane.xlu1 %997  ;;  %v1549_v11 = vpop.eup %1548 }
 0x35f   : > { %1147 = vst.msk [vmem:[%s2151_s20] sm:$0xff] %vm751_vm7, %v1145_v55  ;;  %1550 = vrcp.f32 %v998_v10  ;;  %v956_v18 = vmul.f32 %v1549_v11, %v952_v9 }
 0x360   : > { %v866_v6 = vsub.f32 2.0, %v864_v31 }
 0x361   : > { %v958_v23 = vsub.f32 2.0, %v956_v18 }
 0x362   : > { %v868_v28 = vmul.f32 %v1547_v32, %v866_v6 }
 0x363   : > { %v960_v37 = vmul.f32 %v1549_v11, %v958_v23 }
 0x364   : > { %v870_v7 = vmul.f32 %v2077_v42, %v868_v28  ;;  %v1196_v42 = vld [vmem:[%s2312_s9 + $0x30] sm:$0xff] }
 0x365   : > { %v1551_v15 = vpop.eup %1550  ;;  %1217 = vmatpush.msrb.mxu2 %v1196_v42  ;;  %v962_v52 = vmul.f32 %v2075_v40, %v960_v37 }
 0x366   : > { %872 = vst.msk [vmem:[%s2151_s20 + $0x8] sm:$0xff] %vm697_vm4, %v870_v7  ;;  %v1149_v8 = vld [vmem:[%s2151_s20] sm:$0xff]  ;;  %v1136_v34 = vpop.xlane.xlu1 %1135  ;;  %v1002_v16 = vmul.f32 %v1551_v15, %v998_v10 }
 0x367   : > { %1183 = vmatmul.f32.vlgmr.msrb.gmra.mxu0 %v1149_v8  ;;  %1218 = vmatpush.msrb.mxu2 %v1195_v19 }
 0x368   : > { %v1004_v26 = vsub.f32 2.0, %v1002_v16 }
 0x369   : > { %1219 = vmatpush.msrb.mxu2 %v1194_v20 }
 0x36a   : > { %v1006_v41 = vmul.f32 %v1551_v15, %v1004_v26 }
 0x36b   : > { %1220 = vmatpush.msrb.mxu2 %v1193_v30 }
 0x36c   : > { %v1008_v39 = vmul.f32 %v2086_v49, %v1006_v41 }
 0x36d   : > { %1221 = vmatpush.msrb.mxu2 %v1192_v36 }
 0x36f   : > { %1222 = vmatpush.msrb.mxu2 %v1191_v46 }
 0x371   : > { %1223 = vmatpush.msrb.mxu2 %v1190_v62 }
 0x386   : > { %v906_v14 = vpop.xlane.xlu0 %905 }
 0x387   : > { %1552 = vrcp.f32 %v906_v14 }
 0x388   : > { %1554 = vrcp.f32 %v1090_v22 }
 0x389   : > { %1556 = vrcp.f32 %v1136_v34 }
 0x38d   : > { %v1553_v21 = vpop.eup %1552 }
 0x38e   : > { %v1555_v25 = vpop.eup %1554  ;;  %v910_v27 = vmul.f32 %v1553_v21, %v906_v14  ;;  %v1044_v29 = vpop.xlane.xlu0 %1043 }
 0x38f   : > { %v1557_v33 = vpop.eup %1556  ;;  %1558 = vrcp.f32 %v1044_v29  ;;  %v1094_v38 = vmul.f32 %v1555_v25, %v1090_v22 }
 0x390   : > { %v912_v35 = vsub.f32 2.0, %v910_v27  ;;  %v1140_v44 = vmul.f32 %v1557_v33, %v1136_v34 }
 0x391   : > { %v1096_v57 = vsub.f32 2.0, %v1094_v38 }
 0x392   : > { %v914_v45 = vmul.f32 %v1553_v21, %v912_v35  ;;  %v1142_v58 = vsub.f32 2.0, %v1140_v44 }
 0x393   : > { %v1098_v13 = vmul.f32 %v1555_v25, %v1096_v57 }
 0x394   : > { %v916_v48 = vmul.f32 %v2120_v5, %v914_v45  ;;  %v1144_v59 = vmul.f32 %v1557_v33, %v1142_v58 }
 0x395   : > { %v1559_v50 = vpop.eup %1558  ;;  %v1100_v61 = vmul.f32 %v2084_v43, %v1098_v13 }
 0x396   : > { %918 = vst.msk [vmem:[%s2151_s20 + $0x8] sm:$0xff] %vm706_vm5, %v916_v48  ;;  %v1048_v56 = vmul.f32 %v1559_v50, %v1044_v29  ;;  %v1146_v49 = vmul.f32 %v2093_v53, %v1144_v59 }
 0x397   : > { %964 = vst.msk [vmem:[%s2151_s20 + $0x8] sm:$0xff] %vm715_vm2, %v962_v52 }
 0x398   : > { %1010 = vst.msk [vmem:[%s2151_s20 + $0x8] sm:$0xff] %vm724_vm8, %v1008_v39  ;;  %v1050_v5 = vsub.f32 2.0, %v1048_v56 }
 0x39a   : > { %v1052_v40 = vmul.f32 %v1559_v50, %v1050_v5 }
 0x39c   : > { %v1054_v60 = vmul.f32 %v2128_v54, %v1052_v40 }
 0x39e   : > { %1056 = vst.msk [vmem:[%s2151_s20 + $0x8] sm:$0xff] %vm733_vm3, %v1054_v60 }
 0x39f   : > { %1102 = vst.msk [vmem:[%s2151_s20 + $0x8] sm:$0xff] %vm742_vm1, %v1100_v61 }
 0x3a0   : > { %1148 = vst.msk [vmem:[%s2151_s20 + $0x8] sm:$0xff] %vm751_vm7, %v1146_v49 }
 0x3a7   : > { %v1150_v51 = vld [vmem:[%s2151_s20 + $0x8] sm:$0xff] }
 0x3a8   : > { %1186 = vmatmul.f32.gmra.mxu0 %v1150_v51 }
 0x3e4   : > { %v1184_v54 = vpop.f32.mrf.mxu0 }
 0x3e5   : > { %1416 = vmatmul.msk.f32.vlgmr.msrb.gmra.mxu2 %vm671_vm6, %v1184_v54 }
 0x425   : > { %v1187_v43 = vpop.f32.mrf.mxu0 }
 0x426   : > { %1417 = vmatmul.msk.f32.gmra.mxu2 %vm671_vm6, %v1187_v43 }
 0x427   : > { %1587 = shalt.err (!%p1584_p3)
}
 0x428   : > { %s1665_s20 = smov 128   ;;  %s1666_s15 = smov 8   ;;  %v1495_v53 = vld [vmem:[%s2313_s10] ss:$0 sm:$0xff] }
 0x429   : > { %1436 = dma.vmem_to_hbm [thread:$0]  (%p1770_p5), %s1269_s29, 256, %s1271_s30, %s1239_s28, %s1665_s20, %s1665_s20, %s1666_s15  }
 0x42a   : > { %s2330_s3 = sshll.u32 %s2145_s18, 4  ;;  %s1250_s16 = scalar_lea.hbm %s2314_s11, %s1429_s19 }
 0x42b   : > { %s440_s4 = scalar_lea.vmem [#allocation4], %s2330_s3  ;;  %s1253_s25 = sshll.u32 %s1250_s16, 4  ;;  %s1254_s25 = int_to_ptr.hbm [resolvable:$true] %s1253_s25 }
 0x42c   : > { %s1251_s26 = sshll.u32 %s440_s4, 4  ;;  %s1234_s28 = scalar_lea.sflag [#allocation5], %s2145_s18  ;;  %s1252_s26 = int_to_ptr.vmem [resolvable:$true] %s1251_s26 }
 0x42d   : > { %s1602_s29 = sshra.s32 %s1254_s25, 4  ;;  %s1608_s19 = scalar_lea.hbm %s2314_s11, 32  ;;  %s1603_s29 = int_to_ptr.hbm [resolvable:$true] %s1602_s29 }
 0x42e   : > { %s1604_s30 = scalar_lea.hbm %s1603_s29, 16  ;;  %p1609_p9 = scmp.lt.s32.totalorder %s1603_s29, %s2314_s11 }
 0x42f   : > { %p1605_p4 = scmp.ne.s32.totalorder %s1603_s29, %s1604_s30  ;;  %p1610_p10 = scmp.lt.s32.totalorder %s1608_s19, %s1604_s30 }
 0x431   : > { %p1606_p7 = pnand %p1605_p4, %p1770_p5  ;;  %p1611_p11 = por %p1610_p10, %p1609_p9 }
 0x433   : > { %p1607_p8 = pneg %p1606_p7 }
 0x435   : > { %p1612_p12 = pnand %p1611_p11, %p1607_p8 }
 0x468   : > { %v1225_v63 = vpop.f32.mrf.mxu2 }
 0x469   : > { %v1226_v0 = vadd.f32 %v1495_v53, %v1225_v63 }
 0x46b   : > { %1231 = vst.msk [vmem:[%s440_s4] sm:$0xff] %vm479_vm0, %v1226_v0 }
 0x4a9   : > { %v1228_v1 = vpop.f32.mrf.mxu2 }
 0x4aa   : > { %v1229_v2 = vadd.f32 %v1495_v53, %v1228_v1 }
 0x4ac   : > { %1232 = vst.msk [vmem:[%s440_s4 + $0x8] sm:$0xff] %vm479_vm0, %v1229_v2 }
 0x4ad   : > { %1615 = shalt.err (!%p1612_p12)
}
 0x4ae   : > { %1435 = dma.vmem_to_hbm [thread:$0]  (%p1770_p5), %s1252_s26, 256, %s1254_s25, %s1234_s28, %s1665_s20, %s1665_s20, %s1666_s15  }
 0x4af PF: > { %p1446_p13 = scmp.ge.s32.totalorder %s1654_s24, 2  ;;  %s1285_s18 = sand.u32 1, %s1642_s21  }
 0x4b0   : > { %s1286_s4 = scalar_lea.sflag [#allocation5], %s1285_s18 }
 0x4b1   : > { %p1440_p0 = pnand %p1446_p13, %p1774_p6 }
 0x4b3   : > { %p1441_p1 = pneg %p1440_p0 }
 0x4b5   : > { %1633 = dma.done.wait (%p1441_p1), %s1286_s4, 256  }
 0x4b6   : > { %1635 = vsyncadd (%p1441_p1), %s1286_s4, 4294967040  ;;  %s1296_s1 = scalar_lea.sflag [#allocation7], %s1285_s18 }
 0x4b7   : > { %1637 = dma.done.wait (%p1441_p1), %s1296_s1, 256  }
 0x4b8   : > { %1639 = vsyncadd (%p1441_p1), %s1296_s1, 4294967040  ;;  %s2331_s13 = sld [smem:[#allocation10_spill]]  ;;  %p26_p5 = scmp.ge.s32.totalorder %s1757_s27, 4  }
 0x4b9   : > { %s2332_s21 = smov %s1646_s22  ;;  %s2333_s22 = smov %s1650_s23 }
 0x4ba   : > { %s2335_s24 = smov %s1757_s27  ;;  %28 = sbr.rel (!%p26_p5) target bundleno = 11 (0xb), region = 122 }
 0x4be   : > { %s2334_s23 = smov %s2331_s13 }
 0x4bf   :  { %1302 = vsyncpa [#allocation5], 1 }
 0x4c0   :  { %1304 = vsyncpa [#allocation5 + $0x1], 1 }
 0x4c1   :  { %1305 = vsyncpa [#allocation7], 1 }
 0x4c2   :  { %1307 = vsyncpa [#allocation7 + $0x1], 1 }

</bundles_post_ra>
